<compile_context>
chip_gen: v7x
topology: tpu7x:2x2x1
jax: 0.10.0
libtpu: 0.0.40
codegen_flags: <defaults>
</compile_context>

<pallas_src>
import functools

import jax
import jax.numpy as jnp
from jax.experimental import pallas as pl
from jax.experimental.pallas import tpu as pltpu


def _round_up(n, m):
    return ((n + m - 1) // m) * m


def _choose_tile_b(B):
    # Big MXU-friendly tiles; keep >= 2 grid steps when the batch allows so a
    # v7x chip's two TensorCores both get work on the "parallel" batch axis.
    for t in (512, 256, 128):
        if B >= 2 * t:
            return t
    # Small batch: single grid step over the whole (sublane-rounded) batch.
    return min(128, _round_up(max(B, 8), 8))


def actor_kernel(x_ref, w1_ref, b1_ref, w2_ref, b2_ref, wh_ref, bh_ref,
                 out_ref, *, n_actions, reparam_noise):
    # fc1 + relu (accumulate in f32; relu in f32 so v5e's non-bf16 VPU is fine)
    h1 = jnp.dot(x_ref[...], w1_ref[...],
                 preferred_element_type=jnp.float32) + b1_ref[...]
    h1 = jnp.maximum(h1, 0.0).astype(w2_ref.dtype)                  # (TB, fc1)
    # fc2 + relu
    h2 = jnp.dot(h1, w2_ref[...],
                 preferred_element_type=jnp.float32) + b2_ref[...]
    h2 = jnp.maximum(h2, 0.0).astype(wh_ref.dtype)                  # (TB, fc2)
    # fused mu/sigma head: cols [0:A]=mu, [A:2A]=sigma, rest zero padding.
    head = jnp.dot(h2, wh_ref[...],
                   preferred_element_type=jnp.float32) + bh_ref[...]  # (TB, Hp)
    col = jax.lax.broadcasted_iota(jnp.int32, head.shape, 1)
    is_sigma = (col >= n_actions) & (col < 2 * n_actions)
    # single lane-dense (TB, 128) store: mu unclipped, sigma clamped to [eps, 1]
    out_ref[...] = jnp.where(is_sigma,
                             jnp.clip(head, reparam_noise, 1.0),
                             head)


def actor_forward(state, params, *, reparam_noise=1e-6,
                  compute_dtype=jnp.float32, tile_b=None):
    """ActorNetwork forward on TPU via Pallas.

    state:  (B, input_dim) float32
    params: w1 (D, fc1), b1 (1, fc1), w2 (fc1, fc2), b2 (1, fc2),
            wmu (fc2, A), bmu (1, A), wsig (fc2, A), bsig (1, A)
            (weights stored as (in_features, out_features))
    returns (mu, sigma), each (B, n_actions) float32
    """
    B, D = state.shape
    fc1 = params["w1"].shape[1]
    fc2 = params["w2"].shape[1]
    A = params["wmu"].shape[1]

    if tile_b is None:
        tile_b = _choose_tile_b(B)
    Bp = _round_up(B, tile_b)          # pad batch to a tile multiple
    Dp = _round_up(D, 128)             # pad input features to 128 lanes
    Hp = _round_up(max(2 * A, 128), 128)   # fused head width, lane-dense

    cdt = jnp.dtype(compute_dtype)

    # Zero-pad batch rows & input-feature columns (zero cols x zero w1 rows = no-op).
    xp = jnp.zeros((Bp, Dp), jnp.float32).at[:B, :D].set(state).astype(cdt)
    w1 = jnp.zeros((Dp, fc1), jnp.float32).at[:D, :].set(params["w1"]).astype(cdt)
    w2 = params["w2"].astype(cdt)

    # Fuse + lane-pad the two heads.
    wh = (jnp.zeros((fc2, Hp), jnp.float32)
          .at[:, :A].set(params["wmu"])
          .at[:, A:2 * A].set(params["wsig"])).astype(cdt)
    bh = (jnp.zeros((1, Hp), jnp.float32)
          .at[:, :A].set(params["bmu"])
          .at[:, A:2 * A].set(params["bsig"]))

    b1 = params["b1"].astype(jnp.float32)
    b2 = params["b2"].astype(jnp.float32)

    grid = (Bp // tile_b,)
    # Weights/biases: constant index_map -> fetched once, stay VMEM-resident
    # across the batch grid (~<1 MiB total; no re-DMA per step).
    resident = lambda shape: pl.BlockSpec(shape, lambda i: (0, 0))

    kernel = functools.partial(actor_kernel, n_actions=A,
                               reparam_noise=reparam_noise)

    out = pl.pallas_call(
        kernel,
        out_shape=jax.ShapeDtypeStruct((Bp, Hp), jnp.float32),
        grid=grid,
        in_specs=[
            pl.BlockSpec((tile_b, Dp), lambda i: (i, 0)),   # x tile (pipelined)
            resident((Dp, fc1)), resident((1, fc1)),
            resident((fc1, fc2)), resident((1, fc2)),
            resident((fc2, Hp)), resident((1, Hp)),
        ],
        out_specs=pl.BlockSpec((tile_b, Hp), lambda i: (i, 0)),
        compiler_params=pltpu.CompilerParams(
            dimension_semantics=("parallel",)),
    )(xp, w1, b1, w2, b2, wh, bh)

    mu = out[:B, :A]
    sigma = out[:B, A:2 * A]
    return mu, sigma


def init_actor_params(key, input_dim, fc1_dims=256, fc2_dims=256, n_actions=4):
    """PyTorch nn.Linear default init (U[-1/sqrt(fan_in), +1/sqrt(fan_in)]).
    Weights stored as (in_features, out_features)."""
    def linear(k, fan_in, fan_out):
        kw, kb = jax.random.split(k)
        bound = 1.0 / jnp.sqrt(fan_in)
        w = jax.random.uniform(kw, (fan_in, fan_out), jnp.float32, -bound, bound)
        b = jax.random.uniform(kb, (1, fan_out), jnp.float32, -bound, bound)
        return w, b

    k1, k2, k3, k4 = jax.random.split(key, 4)
    w1, b1 = linear(k1, input_dim, fc1_dims)
    w2, b2 = linear(k2, fc1_dims, fc2_dims)
    wmu, bmu = linear(k3, fc2_dims, n_actions)
    wsig, bsig = linear(k4, fc2_dims, n_actions)
    return dict(w1=w1, b1=b1, w2=w2, b2=b2,
                wmu=wmu, bmu=bmu, wsig=wsig, bsig=bsig)


def actor_forward_ref(state, params, reparam_noise=1e-6):
    """Pure-JAX reference for correctness check."""
    h1 = jnp.maximum(state @ params["w1"] + params["b1"], 0.0)
    h2 = jnp.maximum(h1 @ params["w2"] + params["b2"], 0.0)
    mu = h2 @ params["wmu"] + params["bmu"]
    sigma = jnp.clip(h2 @ params["wsig"] + params["bsig"], reparam_noise, 1.0)
    return mu, sigma


if __name__ == "__main__":
    key = jax.random.PRNGKey(0)
    k_param, k_state = jax.random.split(key)

    batch = 200          # non-multiple of the tile: exercises padding + 2 grid steps
    input_dim = 16       # observation vector dim (input_dims=(16,))
    n_actions = 4
    reparam = 1e-6

    params = init_actor_params(k_param, input_dim, 256, 256, n_actions)
    state = jax.random.normal(k_state, (batch, input_dim), jnp.float32)

    mu_ref, sigma_ref = actor_forward_ref(state, params, reparam)
    lo = float(jnp.float32(reparam))   # the clamp bound as actually stored in f32

    # f32 path (v5e-friendly / strict accuracy)
    mu, sigma = actor_forward(state, params, reparam_noise=reparam)
    jax.block_until_ready((mu, sigma))
    assert mu.shape == (batch, n_actions) and sigma.shape == (batch, n_actions)
    assert jnp.allclose(mu, mu_ref, atol=2e-2, rtol=2e-2)
    assert jnp.allclose(sigma, sigma_ref, atol=2e-2, rtol=2e-2)
    assert float(sigma.min()) >= lo and float(sigma.max()) <= 1.0

    # bf16 weights/activations, f32 accumulate (perf path for v6e/v7x)
    mu_bf, sigma_bf = actor_forward(state, params, reparam_noise=reparam,
                                    compute_dtype=jnp.bfloat16)
    jax.block_until_ready((mu_bf, sigma_bf))
    assert mu_bf.shape == (batch, n_actions) and sigma_bf.shape == (batch, n_actions)
    assert jnp.allclose(mu_bf, mu_ref, atol=1.5e-1, rtol=1.5e-1)
    assert jnp.allclose(sigma_bf, sigma_ref, atol=1.5e-1, rtol=1.5e-1)
    assert float(sigma_bf.min()) >= lo and float(sigma_bf.max()) <= 1.0

    print("KERNEL_OK")
</pallas_src>

<mosaic_0001>
module attributes {stable_mosaic.version = 11 : i64} {
  func.func @actor_kernel(%arg0: i32, %arg1: memref<128x128xf32, #tpu.memory_space<vmem>>, %arg2: memref<128x256xf32, #tpu.memory_space<vmem>>, %arg3: memref<1x256xf32, #tpu.memory_space<vmem>>, %arg4: memref<256x256xf32, #tpu.memory_space<vmem>>, %arg5: memref<1x256xf32, #tpu.memory_space<vmem>>, %arg6: memref<256x128xf32, #tpu.memory_space<vmem>>, %arg7: memref<1x128xf32, #tpu.memory_space<vmem>>, %arg8: memref<128x128xf32, #tpu.memory_space<vmem>>) attributes {dimension_semantics = [#tpu.dimension_semantics<parallel>], iteration_bounds = array<i64: 2>, scalar_prefetch = 0 : i64, scratch_operands = 0 : i64, tpu.core_type = #tpu.core_type<tc>, window_params = [{transform_indices = @transform_0, window_bounds = array<i64: 128, 128>}, {pipeline_mode = #tpu.pipeline_mode<synchronous>, transform_indices = @transform_1, window_bounds = array<i64: 128, 256>}, {pipeline_mode = #tpu.pipeline_mode<synchronous>, transform_indices = @transform_2, window_bounds = array<i64: 1, 256>}, {pipeline_mode = #tpu.pipeline_mode<synchronous>, transform_indices = @transform_3, window_bounds = array<i64: 256, 256>}, {pipeline_mode = #tpu.pipeline_mode<synchronous>, transform_indices = @transform_4, window_bounds = array<i64: 1, 256>}, {pipeline_mode = #tpu.pipeline_mode<synchronous>, transform_indices = @transform_5, window_bounds = array<i64: 256, 128>}, {pipeline_mode = #tpu.pipeline_mode<synchronous>, transform_indices = @transform_6, window_bounds = array<i64: 1, 128>}, {transform_indices = @transform_7, window_bounds = array<i64: 128, 128>}]} {
    %c0 = arith.constant 0 : index
    %c0_0 = arith.constant 0 : index
    %0 = vector.load %arg1[%c0, %c0_0] : memref<128x128xf32, #tpu.memory_space<vmem>>, vector<128x128xf32>
    %c0_1 = arith.constant 0 : index
    %c0_2 = arith.constant 0 : index
    %1 = vector.load %arg2[%c0_1, %c0_2] : memref<128x256xf32, #tpu.memory_space<vmem>>, vector<128x256xf32>
    %cst = arith.constant dense<0.000000e+00> : vector<128x256xf32>
    %2 = tpu.matmul %0, %1, %cst {dimension_numbers = #tpu.dot_dimension_numbers<[1], [0], [0], [1], [0, 0, 1, 1], [], []>} : vector<128x128xf32>, vector<128x256xf32>, vector<128x256xf32> -> vector<128x256xf32>
    %c0_3 = arith.constant 0 : index
    %c0_4 = arith.constant 0 : index
    %3 = vector.load %arg3[%c0_3, %c0_4] : memref<1x256xf32, #tpu.memory_space<vmem>>, vector<1x256xf32>
    %4 = vector.broadcast %3 : vector<1x256xf32> to vector<128x256xf32>
    %5 = arith.addf %2, %4 : vector<128x256xf32>
    %cst_5 = arith.constant 0.000000e+00 : f32
    %6 = vector.broadcast %cst_5 : f32 to vector<128x256xf32>
    %7 = arith.maximumf %5, %6 : vector<128x256xf32>
    %c0_6 = arith.constant 0 : index
    %c0_7 = arith.constant 0 : index
    %8 = vector.load %arg4[%c0_6, %c0_7] : memref<256x256xf32, #tpu.memory_space<vmem>>, vector<256x256xf32>
    %cst_8 = arith.constant dense<0.000000e+00> : vector<128x256xf32>
    %9 = tpu.matmul %7, %8, %cst_8 {dimension_numbers = #tpu.dot_dimension_numbers<[1], [0], [0], [1], [0, 0, 1, 1], [], []>} : vector<128x256xf32>, vector<256x256xf32>, vector<128x256xf32> -> vector<128x256xf32>
    %c0_9 = arith.constant 0 : index
    %c0_10 = arith.constant 0 : index
    %10 = vector.load %arg5[%c0_9, %c0_10] : memref<1x256xf32, #tpu.memory_space<vmem>>, vector<1x256xf32>
    %11 = vector.broadcast %10 : vector<1x256xf32> to vector<128x256xf32>
    %12 = arith.addf %9, %11 : vector<128x256xf32>
    %cst_11 = arith.constant 0.000000e+00 : f32
    %13 = vector.broadcast %cst_11 : f32 to vector<128x256xf32>
    %14 = arith.maximumf %12, %13 : vector<128x256xf32>
    %c0_12 = arith.constant 0 : index
    %c0_13 = arith.constant 0 : index
    %15 = vector.load %arg6[%c0_12, %c0_13] : memref<256x128xf32, #tpu.memory_space<vmem>>, vector<256x128xf32>
    %cst_14 = arith.constant dense<0.000000e+00> : vector<128x128xf32>
    %16 = tpu.matmul %14, %15, %cst_14 {dimension_numbers = #tpu.dot_dimension_numbers<[1], [0], [0], [1], [0, 0, 1, 1], [], []>} : vector<128x256xf32>, vector<256x128xf32>, vector<128x128xf32> -> vector<128x128xf32>
    %c0_15 = arith.constant 0 : index
    %c0_16 = arith.constant 0 : index
    %17 = vector.load %arg7[%c0_15, %c0_16] : memref<1x128xf32, #tpu.memory_space<vmem>>, vector<1x128xf32>
    %18 = vector.broadcast %17 : vector<1x128xf32> to vector<128x128xf32>
    %19 = arith.addf %16, %18 : vector<128x128xf32>
    %20 = tpu.iota {dimensions = array<i32: 1>} : vector<128x128xi32>
    %c4_i32 = arith.constant 4 : i32
    %21 = vector.broadcast %c4_i32 : i32 to vector<128x128xi32>
    %22 = arith.cmpi sge, %20, %21 : vector<128x128xi32>
    %c8_i32 = arith.constant 8 : i32
    %23 = vector.broadcast %c8_i32 : i32 to vector<128x128xi32>
    %24 = arith.cmpi slt, %20, %23 : vector<128x128xi32>
    %25 = arith.andi %22, %24 : vector<128x128xi1>
    %cst_17 = arith.constant 9.99999997E-7 : f32
    %cst_18 = arith.constant 1.000000e+00 : f32
    %26 = vector.broadcast %cst_17 : f32 to vector<128x128xf32>
    %27 = arith.maximumf %26, %19 : vector<128x128xf32>
    %28 = vector.broadcast %cst_18 : f32 to vector<128x128xf32>
    %29 = arith.minimumf %28, %27 : vector<128x128xf32>
    %30 = arith.select %25, %29, %19 : vector<128x128xi1>, vector<128x128xf32>
    %c0_19 = arith.constant 0 : index
    %c0_20 = arith.constant 0 : index
    %31 = vector.load %arg8[%c0_19, %c0_20] : memref<128x128xf32, #tpu.memory_space<vmem>>, vector<128x128xf32>
    tpu.vector_store %arg8[%c0_19, %c0_20], %30 {strides = array<i32>} : memref<128x128xf32, #tpu.memory_space<vmem>>, vector<128x128xf32>,
    return
  }
  func.func @transform_0(%arg0: i32) -> (i32, i32) {
    %c0_i32 = arith.constant 0 : i32
    %c0_i32_0 = arith.constant 0 : i32
    return %arg0, %c0_i32 : i32, i32
  }
  func.func @transform_1(%arg0: i32) -> (i32, i32) {
    %c0_i32 = arith.constant 0 : i32
    %c0_i32_0 = arith.constant 0 : i32
    %c0_i32_1 = arith.constant 0 : i32
    return %c0_i32, %c0_i32_0 : i32, i32
  }
  func.func @transform_2(%arg0: i32) -> (i32, i32) {
    %c0_i32 = arith.constant 0 : i32
    %c0_i32_0 = arith.constant 0 : i32
    %c0_i32_1 = arith.constant 0 : i32
    return %c0_i32, %c0_i32_0 : i32, i32
  }
  func.func @transform_3(%arg0: i32) -> (i32, i32) {
    %c0_i32 = arith.constant 0 : i32
    %c0_i32_0 = arith.constant 0 : i32
    %c0_i32_1 = arith.constant 0 : i32
    return %c0_i32, %c0_i32_0 : i32, i32
  }
  func.func @transform_4(%arg0: i32) -> (i32, i32) {
    %c0_i32 = arith.constant 0 : i32
    %c0_i32_0 = arith.constant 0 : i32
    %c0_i32_1 = arith.constant 0 : i32
    return %c0_i32, %c0_i32_0 : i32, i32
  }
  func.func @transform_5(%arg0: i32) -> (i32, i32) {
    %c0_i32 = arith.constant 0 : i32
    %c0_i32_0 = arith.constant 0 : i32
    %c0_i32_1 = arith.constant 0 : i32
    return %c0_i32, %c0_i32_0 : i32, i32
  }
  func.func @transform_6(%arg0: i32) -> (i32, i32) {
    %c0_i32 = arith.constant 0 : i32
    %c0_i32_0 = arith.constant 0 : i32
    %c0_i32_1 = arith.constant 0 : i32
    return %c0_i32, %c0_i32_0 : i32, i32
  }
  func.func @transform_7(%arg0: i32) -> (i32, i32) {
    %c0_i32 = arith.constant 0 : i32
    %c0_i32_0 = arith.constant 0 : i32
    return %arg0, %c0_i32 : i32, i32
  }
}

</mosaic_0001>

<bundles_post_ra>
// kernel: tpu_custom_call.1
= control target key start
LH: loop header
LB: loop body
LE: loop exit
PB: predicated region body
PF: predicated region fallthrough
CT: control target
= control target key end

     0   :  { %12 = vsyncpa [#allocation3], 0  ;;  %s2326_s0 = inlined_call_operand.hbm [shape: f32[256,128], index: 0, kind: input, shape index: {}]   ;;  %s2327_s1 = inlined_call_operand.hbm [shape: f32[128,256], index: 1, kind: input, shape index: {}]   ;;  %s2328_s2 = inlined_call_operand.vmem [shape: f32[1,256], index: 2, kind: input, shape index: {}]   ;;  %s2329_s3 = inlined_call_operand.hbm [shape: f32[256,256], index: 3, kind: input, shape index: {}]   ;;  %s2330_s4 = inlined_call_operand.vmem [shape: f32[1,256], index: 4, kind: input, shape index: {}]   ;;  %s2331_s5 = inlined_call_operand.hbm [shape: f32[256,128], index: 5, kind: input, shape index: {}]   ;;  %s2332_s6 = inlined_call_operand.vmem [shape: f32[1,128], index: 6, kind: input, shape index: {}]   ;;  %s2333_s7 = inlined_call_operand.hbm [shape: f32[256,128], index: 7, kind: output, shape index: {}]  }
   0x1   :  { %14 = vsyncpa [#allocation3 + $0x1], 0 }
   0x2   :  { %15 = vsyncpa [#allocation6], 0 }
   0x3   :  { %16 = vsyncpa [#allocation9], 0 }
   0x4   :  { %17 = vsyncpa [#allocation4], 0 }
   0x5   :  { %19 = vsyncpa [#allocation4 + $0x1], 0  ;;  %s1807_s24 = smov 0   ;;  %s1809_s25 = smov 0  }
   0x6   :  { %s1811_s26 = smov 0   ;;  %s1813_s27 = smov 0  }
   0x7 LB: > { %s1828_s28 = sadd.s32 4294967295, %s1753_s27   ;;  %s1234_s29 = sadd.s32 4294967294, %s1753_s27   ;;  %s1753_s27 = sphi %s1813_s27, %s2361_s27   ;;  %s1749_s26 = sphi %s1811_s26, %s2360_s26   ;;  %s1745_s25 = sphi %s1809_s25, %s2359_s25   ;;  %s1741_s24 = sphi %s1807_s24, %s2358_s24  }
   0x8   : > { %p45_p0 = scmp.ne.s32.totalorder %s1745_s25, %s1741_s24  ;;  %p2334_p1 = scmp.eq.s32.totalorder %s1828_s28, 0 }
   0x9   : > { %p201_p3 = scmp.eq.s32.totalorder %s1234_s29, 1  ;;  %p1235_p5 = scmp.ge.s32.totalorder %s1753_s27, 1 }
   0xa   : > { %p1837_p4 = por %p2334_p1, %p45_p0  ;;  %p208_p7 = scmp.lt.s32.totalorder %s1753_s27, 3 }
   0xb   : > { %p1842_p6 = por %p201_p3, %p45_p0  ;;  %s1755_s10 = smov [#allocation5]  }
   0xc   : > { %s2338_s30 = scalar_select %p1837_p4, 1, 0 }
   0xd   : > { %s2339_s8 = scalar_select %p1842_p6, 1, 0 }
   0xe   : > { %p1847_p8 = pnand %p1235_p5, %p208_p7  ;;  %s220_s11 = sshll.u32 %s1755_s10, 4  ;;  %s1851_s11 = int_to_ptr.vmem [resolvable:$true] %s220_s11 }
   0xf   : > { %2340 = sst [smem:[#allocation15_spill]] %s2339_s8  ;;  %s1756_s13 = smov [#allocation7]  }
  0x10   : > { %s2341_s9 = scalar_select %p1847_p8, 1, 0 }
  0x11   : > { %p1497_p9 = pneg %p1847_p8  ;;  %s236_s14 = sshll.u32 %s1756_s13, 4  ;;  %s1862_s14 = int_to_ptr.vmem [resolvable:$true] %s236_s14 }
  0x12   : > { %s1757_s15 = smov [#allocation8]   ;;  %s1565_s19 = scalar_lea.hbm %s2327_s1, 4096 }
  0x13   : > { %p1858_p11 = pnand %p1497_p9, %p2334_p1  ;;  %s1864_s16 = sshll.u32 %s1757_s15, 4  ;;  %s253_s16 = int_to_ptr.vmem [resolvable:$true] %s1864_s16 }
  0x14   : > { %p1566_p12 = scmp.ne.s32.totalorder %s2327_s1, %s1565_s19  ;;  %p1572_p5 = scmp.lt.u32.totalorder %s1565_s19, %s2327_s1 }
  0x15   : > { %p1874_p13 = pneg %p1858_p11 }
  0x17   : > { %p1568_p0 = pnand %p1874_p13, %p1566_p12 }
  0x19   : > { %p1569_p3 = pneg %p1568_p0 }
  0x1b   : > { %p1574_p7 = pnand %p1572_p5, %p1569_p3 }
  0x1d   : > { %1577 = shalt.err (!%p1574_p7)
}
  0x1e   : > { %s1578_s10 = scalar_lea.vmem %s1851_s11, 4096  ;;  %p1586_p2 = scmp.lt.s32.totalorder %s1851_s11, %s1851_s11 }
  0x1f   : > { %p1579_p9 = scmp.ne.s32.totalorder %s1851_s11, %s1578_s10  ;;  %p1587_p6 = scmp.lt.s32.totalorder %s1578_s10, %s1578_s10 }
  0x21   : > { %p1581_p10 = pnand %p1579_p9, %p1874_p13  ;;  %p1588_p12 = por %p1587_p6, %p1586_p2 }
  0x23   : > { %p1582_p1 = pneg %p1581_p10 }
  0x25   : > { %p1589_p0 = pnand %p1588_p12, %p1582_p1 }
  0x27   : > { %1592 = shalt.err (!%p1589_p0)
}
  0x28   : > { %s1758_s13 = smov 256   ;;  %s1759_s15 = smov 16  }
  0x29   : > { %1500 = dma.hbm_to_vmem [thread:$0]  (!%p1858_p11), %s2327_s1, 4096, %s1851_s11, [#allocation6], %s1758_s13, %s1758_s13, %s1759_s15  }
  0x2a   : > { %s1593_s21 = scalar_lea.hbm %s2329_s3, 8192 }
  0x2b   : > { %p1594_p2 = scmp.ne.s32.totalorder %s2329_s3, %s1593_s21  ;;  %p1600_p10 = scmp.lt.u32.totalorder %s1593_s21, %s2329_s3 }
  0x2d   : > { %p1596_p1 = pnand %p1594_p2, %p1874_p13 }
  0x2f   : > { %p1597_p6 = pneg %p1596_p1 }
  0x31   : > { %p1602_p3 = pnand %p1600_p10, %p1597_p6 }
  0x33   : > { %1605 = shalt.err (!%p1602_p3)
}
  0x34   : > { %s1606_s11 = scalar_lea.vmem %s1862_s14, 8192  ;;  %p1614_p12 = scmp.lt.s32.totalorder %s1862_s14, %s1862_s14 }
  0x35   : > { %p1607_p5 = scmp.ne.s32.totalorder %s1862_s14, %s1606_s11  ;;  %p1615_p0 = scmp.lt.s32.totalorder %s1606_s11, %s1606_s11 }
  0x37   : > { %p1609_p7 = pnand %p1607_p5, %p1874_p13  ;;  %p1616_p2 = por %p1615_p0, %p1614_p12 }
  0x39   : > { %p1610_p9 = pneg %p1609_p7 }
  0x3b   : > { %p1617_p1 = pnand %p1616_p2, %p1610_p9 }
  0x3d   : > { %1620 = shalt.err (!%p1617_p1)
}
  0x3e   : > { %1503 = dma.hbm_to_vmem [thread:$0]  (!%p1858_p11), %s2329_s3, 8192, %s1862_s14, [#allocation6], %s1758_s13, %s1758_s13, %s1759_s15  }
  0x3f   : > { %s1621_s20 = scalar_lea.hbm %s2331_s5, 4096 }
  0x40   : > { %p1622_p6 = scmp.ne.s32.totalorder %s2331_s5, %s1621_s20  ;;  %p1628_p5 = scmp.lt.u32.totalorder %s1621_s20, %s2331_s5 }
  0x42   : > { %p1624_p10 = pnand %p1622_p6, %p1874_p13 }
  0x44   : > { %p1625_p3 = pneg %p1624_p10 }
  0x46   : > { %p1630_p7 = pnand %p1628_p5, %p1625_p3 }
  0x48   : > { %1633 = shalt.err (!%p1630_p7)
}
  0x49   : > { %s1634_s11 = scalar_lea.vmem %s253_s16, 4096  ;;  %p1642_p2 = scmp.lt.s32.totalorder %s253_s16, %s253_s16 }
  0x4a   : > { %p1635_p9 = scmp.ne.s32.totalorder %s253_s16, %s1634_s11  ;;  %p1643_p1 = scmp.lt.s32.totalorder %s1634_s11, %s1634_s11 }
  0x4c   : > { %p1637_p12 = pnand %p1635_p9, %p1874_p13  ;;  %p1644_p4 = por %p1643_p1, %p1642_p2 }
  0x4e   : > { %p1638_p0 = pneg %p1637_p12 }
  0x50   : > { %p1645_p8 = pnand %p1644_p4, %p1638_p0 }
  0x52   : > { %1648 = shalt.err (!%p1645_p8)
}
  0x53   : > { %s1760_s14 = smov 128   ;;  %s1761_s22 = smov 8  }
  0x54   : > { %1506 = dma.hbm_to_vmem [thread:$0]  (!%p1858_p11), %s2331_s5, 4096, %s253_s16, [#allocation9], %s1760_s14, %s1760_s14, %s1761_s22  }
  0x55   : > { %s1941_s8 = sadd.s32 1, %s1753_s27   ;;  %s32_s18 = sadd.s32 1, %s1749_s26 }
  0x56   : > { %s29_s17 = ssub.s32 %s1753_s27, %s1941_s8  ;;  %p39_p8 = scmp.ne.s32.totalorder %s1749_s26, %s1745_s25 }
  0x57   : > { %p30_p4 = scmp.eq.s32.totalorder %s29_s17, 0  ;;  %p40_p13 = scmp.eq.s32.totalorder %s1753_s27, 0 }
  0x58   : > { %p1518_p6 = scmp.lt.s32.totalorder %s1753_s27, 2  ;;  %p2344_p3 = scmp.eq.s32.totalorder %s1828_s28, 1 }
  0x59   : > { %s1951_s19 = scalar_select %p30_p4, %s1749_s26, %s32_s18  }
  0x5a   : > { %p41_p10 = por %p40_p13, %p39_p8  ;;  %p1955_p5 = por %p2344_p3, %p39_p8 }
  0x5b   : > { %s269_s20 = sand.u32 1, %s1749_s26   ;;  %s1255_s21 = sshll.u32 %s1753_s27, 11 }
  0x5c   : > { %s1240_s16 = sshll.u32 %s269_s20, 7  ;;  %s1964_s10 = scalar_lea.hbm %s2326_s0, %s1255_s21 }
  0x5d   : > { %s273_s11 = scalar_lea.vmem [#allocation2], %s1240_s16  ;;  %p1966_p11 = pnand %p1518_p6, %p41_p10 }
  0x5e   : > { %s280_s13 = sshll.u32 %s273_s11, 4  ;;  %s1972_s17 = scalar_lea.sflag [#allocation3], %s269_s20  ;;  %s1970_s13 = int_to_ptr.vmem [resolvable:$true] %s280_s13 }
  0x5f   : > { %s1649_s18 = scalar_lea.hbm %s1964_s10, 2048  ;;  %p1651_p9 = pneg %p1966_p11 }
  0x60   : > { %p1650_p7 = scmp.ne.s32.totalorder %s1964_s10, %s1649_s18  ;;  %s1654_s23 = scalar_lea.hbm %s2326_s0, 4096 }
  0x61   : > { %p1655_p2 = scmp.lt.u32.totalorder %s1964_s10, %s2326_s0  ;;  %p1656_p1 = scmp.lt.u32.totalorder %s1654_s23, %s1649_s18 }
  0x62   : > { %p1652_p12 = pnand %p1651_p9, %p1650_p7  ;;  %p1658_p8 = scmp.lt.u32.totalorder %s1649_s18, %s1964_s10 }
  0x63   : > { %p1657_p4 = por %p1656_p1, %p1655_p2 }
  0x64   : > { %p1653_p0 = pneg %p1652_p12 }
  0x65   : > { %p1659_p13 = por %p1658_p8, %p1657_p4 }
  0x67   : > { %p1660_p6 = pnand %p1659_p13, %p1653_p0 }
  0x69   : > { %1663 = shalt.err (!%p1660_p6)
}
  0x6a   : > { %s1664_s20 = scalar_lea.vmem %s1970_s13, 2048  ;;  %s1762_s21 = smov [#allocation2]  }
  0x6b   : > { %p1665_p10 = scmp.ne.s32.totalorder %s1970_s13, %s1664_s20  ;;  %s1669_s16 = sshll.u32 %s1762_s21, 4  ;;  %s1670_s16 = int_to_ptr.vmem [resolvable:$false] %s1669_s16 }
  0x6c   : > { %s1671_s29 = scalar_lea.vmem %s1670_s16, 4096  ;;  %p1672_p12 = scmp.lt.s32.totalorder %s1970_s13, %s1670_s16 }
  0x6d   : > { %p1667_p3 = pnand %p1665_p10, %p1651_p9  ;;  %p1673_p2 = scmp.lt.s32.totalorder %s1671_s29, %s1664_s20 }
  0x6f   : > { %p1668_p7 = pneg %p1667_p3  ;;  %p1674_p1 = por %p1673_p2, %p1672_p12 }
  0x71   : > { %p1675_p4 = pnand %p1674_p1, %p1668_p7 }
  0x73   : > { %1678 = shalt.err (!%p1675_p4)
}
  0x74   : > { %1510 = dma.hbm_to_vmem [thread:$0]  (!%p1966_p11), %s1964_s10, 2048, %s1970_s13, %s1972_s17, %s1760_s14, %s1760_s14, %s1761_s22  }
  0x75   : > { %p2347_p9 = scmp.ne.s32.totalorder %s2341_s9, 0 }
  0x76   : > { %s2006_s18 = sand.u32 (!%p2347_p9), 1, %s1745_s25   ;;  %p2348_p0 = scmp.ne.s32.totalorder (!%p2347_p9), %s2338_s30, 0 }
  0x77   : > { %292 = sbr.rel (%p2347_p9) target bundleno = 902 (0x386), region = 48  ;;  %s1244_s23 = sshll.u32 (!%p2347_p9), %s2006_s18, 7 }
  0x78   : > { %s295_s11 = scalar_lea.sflag (!%p2347_p9), [#allocation3], %s2006_s18  ;;  %s2012_s15 = scalar_lea.vmem (!%p2347_p9), [#allocation2], %s1244_s23 }
  0x7e   : > { %1724 = dma.done.wait (%p2348_p0), %s295_s11, 2048  }
  0x7f   : > { %1726 = vsyncadd (%p2348_p0), %s295_s11, 4294965248  ;;  %p2349_p11 = scmp.eq.s32.totalorder %s1828_s28, 0 }
  0x81   : > { %1728 = dma.done.wait (%p2349_p11), [#allocation6], 12288   ;;  %p2350_p8 = pmov %p2349_p11 }
  0x83   : > { %1730 = vsyncadd (%p2350_p8), [#allocation6], 4294955008  ;;  %p2351_p13 = pmov %p2350_p8 }
  0x84   : > { %p2352_p6 = pmov %p2350_p8 }
  0x85   : > { %1732 = dma.done.wait (%p2351_p13), [#allocation9], 4096  }
  0x86   : > { %1734 = vsyncadd (%p2352_p6), [#allocation9], 4294963200  ;;  %v1763_v0 = vmov 0.0   ;;  %v360_v1 = vld [vmem:[#allocation5 + $0x8] sm:$0xff]  ;;  %v362_v2 = vld [vmem:[#allocation5 + $0x18] sm:$0xff]  ;;  %s2213_s17 = scalar_lea.vmem [#allocation10], %s1244_s23 }
  0x87   : > { %467 = vmatprep.mubr.f32.mxu0 %v1763_v0  ;;  %v359_v3 = vld [vmem:[#allocation5] sm:$0xff]  ;;  %v1337_v4 = vpack.c.bf16 %v362_v2, %v360_v1  ;;  %v361_v5 = vld [vmem:[#allocation5 + $0x10] sm:$0xff]  ;;  %v364_v6 = vld [vmem:[#allocation5 + $0x28] sm:$0xff]  ;;  %s1256_s20 = sshll.u32 %s1828_s28, 11  ;;  %s1132_s21 = sshll.u32 %s2213_s17, 4  ;;  %s2279_s21 = int_to_ptr.vmem [resolvable:$true] %s1132_s21 }
  0x88   : > { %v366_v7 = vld [vmem:[#allocation5 + $0x38] sm:$0xff]  ;;  %v1339_v8 = vpack.c.bf16 %v361_v5, %v359_v3  ;;  %v363_v10 = vld [vmem:[#allocation5 + $0x20] sm:$0xff]  ;;  %v365_v11 = vld [vmem:[#allocation5 + $0x30] sm:$0xff]  ;;  %s2277_s23 = scalar_lea.hbm %s2333_s7, %s1256_s20  ;;  %s1119_s28 = scalar_lea.sflag [#allocation4], %s2006_s18 }
  0x89   : > { %v1341_v9 = vpack.c.bf16 %v366_v7, %v364_v6  ;;  %v368_v12 = vld [vmem:[#allocation5 + $0x48] sm:$0xff]  ;;  %1338 = vmatprep.subr.bf16.mxu0 %v1337_v4  ;;  %v370_v13 = vld [vmem:[#allocation5 + $0x58] sm:$0xff]  ;;  %v1343_v14 = vpack.c.bf16 %v365_v11, %v363_v10  ;;  %v367_v16 = vld [vmem:[#allocation5 + $0x40] sm:$0xff]  ;;  %s1679_s11 = scalar_lea.vmem %s2279_s21, 2048 }
  0x8a   : > { %1340 = vmatpush1.bf16.msra.mxu0 %v1339_v8  ;;  %v1345_v15 = vpack.c.bf16 %v370_v13, %v368_v12  ;;  %v369_v17 = vld [vmem:[#allocation5 + $0x50] sm:$0xff]  ;;  %v372_v18 = vld [vmem:[#allocation5 + $0x68] sm:$0xff]  ;;  %v374_v19 = vld [vmem:[#allocation5 + $0x78] sm:$0xff]  ;;  %p1680_p10 = scmp.ne.s32.totalorder %s2279_s21, %s1679_s11 }
  0x8b   : > { %1342 = vmatprep.subr.bf16.mxu0 %v1341_v9  ;;  %v1347_v20 = vpack.c.bf16 %v369_v17, %v367_v16  ;;  %v1349_v21 = vpack.c.bf16 %v374_v19, %v372_v18  ;;  %v371_v22 = vld [vmem:[#allocation5 + $0x60] sm:$0xff]  ;;  %v373_v23 = vld [vmem:[#allocation5 + $0x70] sm:$0xff]  ;;  %v376_v24 = vld [vmem:[#allocation5 + $0x88] sm:$0xff] }
  0x8c   : > { %v378_v25 = vld [vmem:[#allocation5 + $0x98] sm:$0xff]  ;;  %v1351_v26 = vpack.c.bf16 %v373_v23, %v371_v22  ;;  %v375_v28 = vld [vmem:[#allocation5 + $0x80] sm:$0xff]  ;;  %v377_v29 = vld [vmem:[#allocation5 + $0x90] sm:$0xff]  ;;  %p1681_p3 = pnand %p1680_p10, %p1955_p5 }
  0x8d   : > { %v1353_v27 = vpack.c.bf16 %v378_v25, %v376_v24  ;;  %v380_v30 = vld [vmem:[#allocation5 + $0xa8] sm:$0xff]  ;;  %v382_v31 = vld [vmem:[#allocation5 + $0xb8] sm:$0xff]  ;;  %v379_v32 = vld [vmem:[#allocation5 + $0xa0] sm:$0xff]  ;;  %v1355_v34 = vpack.c.bf16 %v377_v29, %v375_v28 }
  0x8e   : > { %1344 = vmatpush1.bf16.msra.mxu0 %v1343_v14  ;;  %v381_v33 = vld [vmem:[#allocation5 + $0xb0] sm:$0xff]  ;;  %v384_v35 = vld [vmem:[#allocation5 + $0xc8] sm:$0xff]  ;;  %v386_v36 = vld [vmem:[#allocation5 + $0xd8] sm:$0xff]  ;;  %v1357_v40 = vpack.c.bf16 %v382_v31, %v380_v30  ;;  %p1682_p7 = pneg %p1681_p3 }
  0x8f   : > { %1346 = vmatprep.subr.bf16.mxu0 %v1345_v15  ;;  %v597_v37 = vld [vmem:[#allocation7 + $0x8] sm:$0xff]  ;;  %v599_v38 = vld [vmem:[#allocation7 + $0x18] sm:$0xff]  ;;  %v596_v39 = vld [vmem:[#allocation7] sm:$0xff]  ;;  %v1359_v51 = vpack.c.bf16 %v381_v33, %v379_v32  ;;  %v1361_v55 = vpack.c.bf16 %v386_v36, %v384_v35 }
  0x90   : > { %v1369_v41 = vpack.c.bf16 %v599_v38, %v597_v37  ;;  %v598_v42 = vld [vmem:[#allocation7 + $0x10] sm:$0xff]  ;;  %v601_v43 = vld [vmem:[#allocation7 + $0x28] sm:$0xff]  ;;  %v603_v44 = vld [vmem:[#allocation7 + $0x38] sm:$0xff] }
  0x91   : > { %v1371_v45 = vpack.c.bf16 %v598_v42, %v596_v39  ;;  %v1373_v46 = vpack.c.bf16 %v603_v44, %v601_v43  ;;  %v600_v47 = vld [vmem:[#allocation7 + $0x20] sm:$0xff]  ;;  %v602_v48 = vld [vmem:[#allocation7 + $0x30] sm:$0xff]  ;;  %v605_v49 = vld [vmem:[#allocation7 + $0x48] sm:$0xff] }
  0x92   : > { %1348 = vmatpush1.bf16.msra.mxu0 %v1347_v20  ;;  %1370 = vmatprep.subr.bf16.mxu1 %v1369_v41  ;;  %v607_v50 = vld [vmem:[#allocation7 + $0x58] sm:$0xff]  ;;  %v383_v52 = vld [vmem:[#allocation5 + $0xc0] sm:$0xff]  ;;  %v385_v53 = vld [vmem:[#allocation5 + $0xd0] sm:$0xff]  ;;  %v1375_v54 = vpack.c.bf16 %v602_v48, %v600_v47 }
  0x93   : > { %1350 = vmatprep.subr.bf16.mxu0 %v1349_v21  ;;  %1372 = vmatpush1.bf16.msra.mxu1 %v1371_v45  ;;  %v388_v56 = vld [vmem:[#allocation5 + $0xe8] sm:$0xff]  ;;  %v1377_v57 = vpack.c.bf16 %v607_v50, %v605_v49  ;;  %v604_v58 = vld [vmem:[#allocation7 + $0x40] sm:$0xff]  ;;  %v606_v59 = vld [vmem:[#allocation7 + $0x50] sm:$0xff]  ;;  %v1363_v63 = vpack.c.bf16 %v385_v53, %v383_v52 }
  0x94   : > { %1374 = vmatprep.subr.bf16.mxu1 %v1373_v46  ;;  %v390_v60 = vld [vmem:[#allocation5 + $0xf8] sm:$0xff]  ;;  %v609_v61 = vld [vmem:[#allocation7 + $0x68] sm:$0xff]  ;;  %v387_v1 = vld [vmem:[#allocation5 + $0xe0] sm:$0xff]  ;;  %v1379_v2 = vpack.c.bf16 %v606_v59, %v604_v58 }
  0x95   : > { %v611_v62 = vld [vmem:[#allocation7 + $0x78] sm:$0xff]  ;;  %v1365_v3 = vpack.c.bf16 %v390_v60, %v388_v56  ;;  %v389_v4 = vld [vmem:[#allocation5 + $0xf0] sm:$0xff]  ;;  %v608_v6 = vld [vmem:[#allocation7 + $0x60] sm:$0xff] }
  0x96   : > { %1352 = vmatpush1.bf16.msra.mxu0 %v1351_v26  ;;  %v1381_v5 = vpack.c.bf16 %v611_v62, %v609_v61  ;;  %v610_v7 = vld [vmem:[#allocation7 + $0x70] sm:$0xff]  ;;  %v613_v8 = vld [vmem:[#allocation7 + $0x88] sm:$0xff]  ;;  %v615_v9 = vld [vmem:[#allocation7 + $0x98] sm:$0xff]  ;;  %v1367_v10 = vpack.c.bf16 %v389_v4, %v387_v1 }
  0x97   : > { %1354 = vmatprep.subr.bf16.mxu0 %v1353_v27  ;;  %1376 = vmatpush1.bf16.msra.mxu1 %v1375_v54  ;;  %v1383_v11 = vpack.c.bf16 %v610_v7, %v608_v6  ;;  %v1385_v12 = vpack.c.bf16 %v615_v9, %v613_v8  ;;  %v612_v13 = vld [vmem:[#allocation7 + $0x80] sm:$0xff]  ;;  %v614_v14 = vld [vmem:[#allocation7 + $0x90] sm:$0xff]  ;;  %v617_v15 = vld [vmem:[#allocation7 + $0xa8] sm:$0xff] }
  0x98   : > { %1378 = vmatprep.subr.bf16.mxu1 %v1377_v57  ;;  %v619_v16 = vld [vmem:[#allocation7 + $0xb8] sm:$0xff]  ;;  %v343_v17 = vld [vmem:[%s2012_s15] sm:$0xff]  ;;  %v1387_v18 = vpack.c.bf16 %v614_v14, %v612_v13  ;;  %v618_v21 = vld [vmem:[#allocation7 + $0xb0] sm:$0xff] }
  0x99   : > { %v1389_v19 = vpack.c.bf16 %v619_v16, %v617_v15  ;;  %v616_v20 = vld [vmem:[#allocation7 + $0xa0] sm:$0xff]  ;;  %v621_v22 = vld [vmem:[#allocation7 + $0xc8] sm:$0xff]  ;;  %v623_v23 = vld [vmem:[#allocation7 + $0xd8] sm:$0xff] }
  0x9a   : > { %1356 = vmatpush1.bf16.msra.mxu0 %v1355_v34  ;;  %v344_v24 = vld [vmem:[%s2012_s15 + $0x8] sm:$0xff]  ;;  %v1391_v25 = vpack.c.bf16 %v618_v21, %v616_v20  ;;  %v1393_v26 = vpack.c.bf16 %v623_v23, %v621_v22  ;;  %v620_v27 = vld [vmem:[#allocation7 + $0xc0] sm:$0xff]  ;;  %v622_v28 = vld [vmem:[#allocation7 + $0xd0] sm:$0xff] }
  0x9b   : > { %1358 = vmatprep.subr.bf16.mxu0 %v1357_v40  ;;  %1380 = vmatpush1.bf16.msra.mxu1 %v1379_v2  ;;  %v625_v29 = vld [vmem:[#allocation7 + $0xe8] sm:$0xff]  ;;  %v627_v30 = vld [vmem:[#allocation7 + $0xf8] sm:$0xff]  ;;  %v345_v31 = vld [vmem:[%s2012_s15 + $0x10] sm:$0xff]  ;;  %v1395_v32 = vpack.c.bf16 %v622_v28, %v620_v27 }
  0x9c   : > { %1382 = vmatprep.subr.bf16.mxu1 %v1381_v5  ;;  %v1397_v33 = vpack.c.bf16 %v627_v30, %v625_v29  ;;  %v624_v34 = vld [vmem:[#allocation7 + $0xe0] sm:$0xff]  ;;  %v626_v35 = vld [vmem:[#allocation7 + $0xf0] sm:$0xff]  ;;  %v629_v36 = vld [vmem:[#allocation7 + $0x108] sm:$0xff] }
  0x9d   : > { %v631_v37 = vld [vmem:[#allocation7 + $0x118] sm:$0xff]  ;;  %v1399_v39 = vpack.c.bf16 %v626_v35, %v624_v34  ;;  %v628_v41 = vld [vmem:[#allocation7 + $0x100] sm:$0xff]  ;;  %v630_v42 = vld [vmem:[#allocation7 + $0x110] sm:$0xff] }
  0x9e   : > { %1360 = vmatpush1.bf16.msra.mxu0 %v1359_v51  ;;  %v346_v38 = vld [vmem:[%s2012_s15 + $0x18] sm:$0xff]  ;;  %v1401_v40 = vpack.c.bf16 %v631_v37, %v629_v36  ;;  %v633_v43 = vld [vmem:[#allocation7 + $0x128] sm:$0xff]  ;;  %v347_v45 = vld [vmem:[%s2012_s15 + $0x20] sm:$0xff]  ;;  %v1403_v46 = vpack.c.bf16 %v630_v42, %v628_v41 }
  0x9f   : > { %1362 = vmatprep.subr.bf16.mxu0 %v1361_v55  ;;  %1384 = vmatpush1.bf16.msra.mxu1 %v1383_v11  ;;  %v635_v44 = vld [vmem:[#allocation7 + $0x138] sm:$0xff]  ;;  %v632_v48 = vld [vmem:[#allocation7 + $0x120] sm:$0xff]  ;;  %v634_v49 = vld [vmem:[#allocation7 + $0x130] sm:$0xff] }
  0xa0   : > { %1386 = vmatprep.subr.bf16.mxu1 %v1385_v12  ;;  %v1405_v47 = vpack.c.bf16 %v635_v44, %v633_v43  ;;  %v637_v50 = vld [vmem:[#allocation7 + $0x148] sm:$0xff]  ;;  %v639_v51 = vld [vmem:[#allocation7 + $0x158] sm:$0xff]  ;;  %v1407_v53 = vpack.c.bf16 %v634_v49, %v632_v48  ;;  %v636_v55 = vld [vmem:[#allocation7 + $0x140] sm:$0xff] }
  0xa1   : > { %v348_v52 = vld [vmem:[%s2012_s15 + $0x28] sm:$0xff]  ;;  %v1409_v54 = vpack.c.bf16 %v639_v51, %v637_v50  ;;  %v638_v56 = vld [vmem:[#allocation7 + $0x150] sm:$0xff]  ;;  %v643_v58 = vld [vmem:[#allocation7 + $0x178] sm:$0xff] }
  0xa2   : > { %1364 = vmatpush1.bf16.msra.mxu0 %v1363_v63  ;;  %v641_v57 = vld [vmem:[#allocation7 + $0x168] sm:$0xff]  ;;  %v349_v59 = vld [vmem:[%s2012_s15 + $0x30] sm:$0xff]  ;;  %v1411_v60 = vpack.c.bf16 %v638_v56, %v636_v55  ;;  %v640_v62 = vld [vmem:[#allocation7 + $0x160] sm:$0xff] }
  0xa3   : > { %1366 = vmatprep.subr.bf16.mxu0 %v1365_v3  ;;  %1388 = vmatpush1.bf16.msra.mxu1 %v1387_v18  ;;  %v1413_v61 = vpack.c.bf16 %v643_v58, %v641_v57  ;;  %v642_v63 = vld [vmem:[#allocation7 + $0x170] sm:$0xff]  ;;  %v645_v1 = vld [vmem:[#allocation7 + $0x188] sm:$0xff]  ;;  %v647_v2 = vld [vmem:[#allocation7 + $0x198] sm:$0xff] }
  0xa4   : > { %1390 = vmatprep.subr.bf16.mxu1 %v1389_v19  ;;  %v350_v3 = vld [vmem:[%s2012_s15 + $0x38] sm:$0xff]  ;;  %v1415_v4 = vpack.c.bf16 %v642_v63, %v640_v62  ;;  %v1417_v5 = vpack.c.bf16 %v647_v2, %v645_v1  ;;  %v644_v6 = vld [vmem:[#allocation7 + $0x180] sm:$0xff]  ;;  %v646_v7 = vld [vmem:[#allocation7 + $0x190] sm:$0xff] }
  0xa5   : > { %v649_v8 = vld [vmem:[#allocation7 + $0x1a8] sm:$0xff]  ;;  %v651_v9 = vld [vmem:[#allocation7 + $0x1b8] sm:$0xff]  ;;  %v1419_v11 = vpack.c.bf16 %v646_v7, %v644_v6  ;;  %v648_v13 = vld [vmem:[#allocation7 + $0x1a0] sm:$0xff] }
  0xa6   : > { %1368 = vmatpush1.bf16.msra.mxu0 %v1367_v10  ;;  %v351_v10 = vld [vmem:[%s2012_s15 + $0x40] sm:$0xff]  ;;  %v1421_v12 = vpack.c.bf16 %v651_v9, %v649_v8  ;;  %v650_v14 = vld [vmem:[#allocation7 + $0x1b0] sm:$0xff]  ;;  %v653_v15 = vld [vmem:[#allocation7 + $0x1c8] sm:$0xff] }
  0xa7   : > { %1392 = vmatpush1.bf16.msra.mxu1 %v1391_v25  ;;  %v655_v16 = vld [vmem:[#allocation7 + $0x1d8] sm:$0xff]  ;;  %v1423_v18 = vpack.c.bf16 %v650_v14, %v648_v13  ;;  %v353_v20 = vld [vmem:[%s2012_s15 + $0x50] sm:$0xff]  ;;  %v355_v22 = vld [vmem:[%s2012_s15 + $0x60] sm:$0xff] }
  0xa8   : > { %1394 = vmatprep.subr.bf16.mxu1 %v1393_v26  ;;  %v1425_v19 = vpack.c.bf16 %v655_v16, %v653_v15  ;;  %v354_v21 = vld [vmem:[%s2012_s15 + $0x58] sm:$0xff]  ;;  %v356_v23 = vld [vmem:[%s2012_s15 + $0x68] sm:$0xff]  ;;  %v652_v26 = vld [vmem:[#allocation7 + $0x1c0] sm:$0xff] }
  0xa9   : > { %468 = vmatmul.mubr.f32.vlgmr.msra.gmra.mrb[0].mxu0 %v343_v17  ;;  %v352_v17 = vld [vmem:[%s2012_s15 + $0x48] sm:$0xff]  ;;  %v358_v25 = vld [vmem:[%s2012_s15 + $0x78] sm:$0xff]  ;;  %v654_v27 = vld [vmem:[#allocation7 + $0x1d0] sm:$0xff] }
  0xaa   : > { %473 = vmatprep.mubr.f32.mxu0 %v1763_v0  ;;  %v1427_v28 = vpack.c.bf16 %v654_v27, %v652_v26  ;;  %v657_v29 = vld [vmem:[#allocation7 + $0x1e8] sm:$0xff]  ;;  %v659_v30 = vld [vmem:[#allocation7 + $0x1f8] sm:$0xff]  ;;  %v881_v35 = vld [vmem:[#allocation8 + $0x80] sm:$0xff] }
  0xab   : > { %1396 = vmatpush1.bf16.msra.mxu1 %v1395_v32  ;;  %v656_v32 = vld [vmem:[#allocation7 + $0x1e0] sm:$0xff]  ;;  %v882_v36 = vld [vmem:[#allocation8 + $0x88] sm:$0xff]  ;;  %v867_v43 = vld [vmem:[#allocation8 + $0x10] sm:$0xff] }
  0xac   : > { %1398 = vmatprep.subr.bf16.mxu1 %v1397_v33  ;;  %v658_v33 = vld [vmem:[#allocation7 + $0x1f0] sm:$0xff]  ;;  %v865_v37 = vld [vmem:[#allocation8] sm:$0xff]  ;;  %v868_v44 = vld [vmem:[#allocation8 + $0x18] sm:$0xff] }
  0xad   : > { %474 = vmatmul.mubr.f32.gmra.mrb[2].mxu0 %v344_v24  ;;  %v357_v24 = vld [vmem:[%s2012_s15 + $0x70] sm:$0xff]  ;;  %v1431_v34 = vpack.c.bf16 %v658_v33, %v656_v32  ;;  %v869_v49 = vld [vmem:[#allocation8 + $0x20] sm:$0xff]  ;;  %v870_v50 = vld [vmem:[#allocation8 + $0x28] sm:$0xff]  ;;  %s1764_s15 = smov [#allocation10]  }
  0xae   : > { %479 = vmatprep.mubr.f32.mxu0 %v1763_v0  ;;  %v887_v51 = vld [vmem:[#allocation8 + $0xb0] sm:$0xff]  ;;  %v872_v56 = vld [vmem:[#allocation8 + $0x38] sm:$0xff]  ;;  %v889_v57 = vld [vmem:[#allocation8 + $0xc0] sm:$0xff]  ;;  %s1683_s30 = sshll.u32 %s1764_s15, 4  ;;  %s1684_s30 = int_to_ptr.vmem [resolvable:$false] %s1683_s30 }
  0xaf   : > { %1400 = vmatpush1.bf16.msra.mxu1 %v1399_v39  ;;  %v866_v39 = vld [vmem:[#allocation8 + $0x8] sm:$0xff]  ;;  %v871_v55 = vld [vmem:[#allocation8 + $0x30] sm:$0xff]  ;;  %v892_v1 = vld [vmem:[#allocation8 + $0xd8] sm:$0xff]  ;;  %s1685_s9 = scalar_lea.vmem %s1684_s30, 4096  ;;  %p1686_p12 = scmp.lt.s32.totalorder %s2279_s21, %s1684_s30 }
  0xb0   : > { %1402 = vmatprep.subr.bf16.mxu1 %v1401_v40  ;;  %v884_v40 = vld [vmem:[#allocation8 + $0x98] sm:$0xff]  ;;  %v2058_v41 = vpack.c.bf16 %v866_v39, %v865_v37  ;;  %v890_v58 = vld [vmem:[#allocation8 + $0xc8] sm:$0xff]  ;;  %v891_v63 = vld [vmem:[#allocation8 + $0xd0] sm:$0xff]  ;;  %p1687_p2 = scmp.lt.s32.totalorder %s1685_s9, %s1679_s11 }
  0xb1   : > { %480 = vmatmul.mubr.f32.gmra.mrb[4].mxu0 %v345_v31  ;;  %v1429_v31 = vpack.c.bf16 %v659_v30, %v657_v29  ;;  %v874_v62 = vld [vmem:[#allocation8 + $0x48] sm:$0xff]  ;;  %v893_v6 = vld [vmem:[#allocation8 + $0xe0] sm:$0xff] }
  0xb2   : > { %485 = vmatprep.mubr.f32.mxu0 %v1763_v0  ;;  %v894_v7 = vld [vmem:[#allocation8 + $0xe8] sm:$0xff]  ;;  %v391_v13 = vld [vmem:[%s2328_s2] sm:$0x3]  ;;  %p1688_p1 = por %p1687_p2, %p1686_p12 }
  0xb3   : > { %1404 = vmatpush1.bf16.msra.mxu1 %v1403_v46  ;;  %v886_v46 = vld [vmem:[#allocation8 + $0xa8] sm:$0xff]  ;;  %v2090_v9 = vpack.c.bf16 %v894_v7, %v893_v6 }
  0xb4   : > { %1406 = vmatprep.subr.bf16.mxu1 %v1405_v47  ;;  %v2063_v47 = vpack.c.bf16 %v868_v44, %v867_v43  ;;  %p1689_p4 = pnand %p1688_p1, %p1682_p7 }
  0xb5   : > { %486 = vmatmul.mubr.f32.gmra.mrb[6].mxu0 %v346_v38  ;;  %v1433_v38 = vpack.c.bf16 %v882_v36, %v881_v35 }
  0xb6   : > { %491 = vmatprep.mubr.f32.mxu0 %v1763_v0 }
  0xb7   : > { %1408 = vmatpush1.bf16.msra.mxu1 %v1407_v53  ;;  %1434 = vmatprep.subr.bf16.mxu0 %v1433_v38  ;;  %v2069_v53 = vpack.c.bf16 %v870_v50, %v869_v49 }
  0xb8   : > { %1410 = vmatprep.subr.bf16.mxu1 %v1409_v54  ;;  %1436 = vmatpush3.bf16.msra.mxu0 %v2058_v41 }
  0xb9   : > { %492 = vmatmul.mubr.f32.gmra.mrb[8].mxu0 %v347_v45  ;;  %v885_v45 = vld [vmem:[#allocation8 + $0xa0] sm:$0xff] }
  0xba   : > { %497 = vmatprep.mubr.f32.mxu0 %v1763_v0  ;;  %v2066_v48 = vpack.c.bf16 %v886_v46, %v885_v45 }
  0xbb   : > { %1412 = vmatpush1.bf16.msra.mxu1 %v1411_v60  ;;  %v2078_v60 = vpack.c.bf16 %v890_v58, %v889_v57 }
  0xbc   : > { %1414 = vmatprep.subr.bf16.mxu1 %v1413_v61  ;;  %v873_v61 = vld [vmem:[#allocation8 + $0x40] sm:$0xff] }
  0xbd   : > { %498 = vmatmul.mubr.f32.gmra.mrb[10].mxu0 %v348_v52  ;;  %v888_v52 = vld [vmem:[#allocation8 + $0xb8] sm:$0xff]  ;;  %v2081_v2 = vpack.c.bf16 %v874_v62, %v873_v61 }
  0xbe   : > { %503 = vmatprep.mubr.f32.mxu0 %v1763_v0  ;;  %v2072_v54 = vpack.c.bf16 %v888_v52, %v887_v51 }
  0xbf   : > { %1416 = vmatpush1.bf16.msra.mxu1 %v1415_v4  ;;  %v875_v4 = vld [vmem:[#allocation8 + $0x50] sm:$0xff] }
  0xc0   : > { %1418 = vmatprep.subr.bf16.mxu1 %v1417_v5  ;;  %v876_v5 = vld [vmem:[#allocation8 + $0x58] sm:$0xff] }
  0xc1   : > { %504 = vmatmul.mubr.f32.gmra.mrb[12].mxu0 %v349_v59  ;;  %v2075_v59 = vpack.c.bf16 %v872_v56, %v871_v55  ;;  %v2087_v8 = vpack.c.bf16 %v876_v5, %v875_v4 }
  0xc2   : > { %509 = vmatprep.mubr.f32.mxu0 %v1763_v0 }
  0xc3   : > { %1420 = vmatpush1.bf16.msra.mxu1 %v1419_v11 }
  0xc4   : > { %1422 = vmatprep.subr.bf16.mxu1 %v1421_v12 }
  0xc5   : > { %510 = vmatmul.mubr.f32.gmra.mrb[14].mxu0 %v350_v3  ;;  %v2084_v3 = vpack.c.bf16 %v892_v1, %v891_v63 }
  0xc6   : > { %515 = vmatprep.mubr.f32.mxu0 %v1763_v0 }
  0xc7   : > { %1424 = vmatpush1.bf16.msra.mxu1 %v1423_v18 }
  0xc8   : > { %1426 = vmatprep.subr.bf16.mxu1 %v1425_v19 }
  0xc9   : > { %516 = vmatmul.mubr.f32.gmra.mrb[16].mxu0 %v351_v10  ;;  %v393_v10 = vlaneseq }
  0xca   : > { %521 = vmatprep.mubr.f32.mxu0 %v1763_v0 }
  0xcb   : > { %1428 = vmatpush1.bf16.msra.mxu1 %v1427_v28  ;;  %v2095_v11 = vshrl.u32 %v393_v10, 7 }
  0xcc   : > { %1430 = vmatprep.subr.bf16.mxu1 %v1429_v31 }
  0xcd   : > { %522 = vmatmul.mubr.f32.gmra.mrb[18].mxu0 %v352_v17  ;;  %v395_v12 = vsub.s32 0, %v2095_v11  ;;  %v399_v14 = vsub.s32 1, %v2095_v11 }
  0xce   : > { %527 = vmatprep.mubr.f32.mxu0 %v1763_v0 }
  0xcf   : > { %1432 = vmatpush1.bf16.msra.mxu1 %v1431_v34  ;;  %v2104_v15 = vrot.slane %v391_v13, %v395_v12  ;;  %v2108_v16 = vrot.slane %v391_v13, %v399_v14 }
  0xd0   : > { %1465 = vmatprep.subr.bf16.mxu1 %v1433_v38 }
  0xd1   : > { %528 = vmatmul.mubr.f32.gmra.mrb[20].mxu0 %v353_v20 }
  0xd2   : > { %533 = vmatprep.mubr.f32.mxu0 %v1763_v0 }
  0xd5   : > { %534 = vmatmul.mubr.f32.gmra.mrb[22].mxu0 %v354_v21 }
  0xd6   : > { %539 = vmatprep.mubr.f32.mxu0 %v1763_v0 }
  0xd9   : > { %540 = vmatmul.mubr.f32.gmra.mrb[24].mxu0 %v355_v22 }
  0xda   : > { %545 = vmatprep.mubr.f32.mxu0 %v1763_v0 }
  0xdd   : > { %546 = vmatmul.mubr.f32.gmra.mrb[26].mxu0 %v356_v23 }
  0xde   : > { %551 = vmatprep.mubr.f32.mxu0 %v1763_v0 }
  0xe1   : > { %552 = vmatmul.mubr.f32.gmra.mrb[28].mxu0 %v357_v24 }
  0xe2   : > { %557 = vmatprep.mubr.f32.mxu0 %v1763_v0  ;;  %v883_v0 = vld [vmem:[#allocation8 + $0x90] sm:$0xff] }
  0xe3   : > { %v2060_v42 = vpack.c.bf16 %v884_v40, %v883_v0 }
  0xe5   : > { %558 = vmatmul.mubr.f32.gmra.mrb[30].mxu0 %v358_v25  ;;  %1438 = vmatprep.subr.bf16.mxu0 %v2060_v42 }
  0xe6   : > { %1440 = vmatpush3.bf16.msra.mxu0 %v2063_v47 }
  0xe7   : > { %1442 = vmatprep.subr.bf16.mxu0 %v2066_v48 }
  0xea   : > { %1444 = vmatpush3.bf16.msra.mxu0 %v2069_v53 }
  0xeb   : > { %1446 = vmatprep.subr.bf16.mxu0 %v2072_v54 }
  0xee   : > { %1448 = vmatpush3.bf16.msra.mxu0 %v2075_v59 }
  0xef   : > { %1450 = vmatprep.subr.bf16.mxu0 %v2078_v60 }
  0xf2   : > { %1452 = vmatpush3.bf16.msra.mxu0 %v2081_v2 }
  0xf3   : > { %1454 = vmatprep.subr.bf16.mxu0 %v2084_v3 }
  0xf6   : > { %1456 = vmatpush3.bf16.msra.mxu0 %v2087_v8 }
  0xf7   : > { %1458 = vmatprep.subr.bf16.mxu0 %v2090_v9 }
 0x17c   : > { %v469_v17 = vpop.f32.mrb[0].mxu0 }
 0x17d   : > { %v470_v18 = vadd.f32 %v469_v17, %v2104_v15  ;;  %v471_v19 = vpop.f32.mrb[1].mxu0 }
 0x17e   : > { %v472_v20 = vadd.f32 %v471_v19, %v2108_v16 }
 0x17f   : > { %v564_v23 = vmax.f32 %v470_v18, 0.0 }
 0x180   : > { %v475_v21 = vpop.f32.mrb[2].mxu0  ;;  %v565_v22 = vmax.f32 %v472_v20, 0.0 }
 0x181   : > { %v476_v24 = vadd.f32 %v475_v21, %v2104_v15  ;;  %v477_v25 = vpop.f32.mrb[3].mxu0 }
 0x182   : > { %v478_v26 = vadd.f32 %v477_v25, %v2108_v16  ;;  %736 = vmatprep.mubr.f32.mxu1 %v565_v22 }
 0x183   : > { %737 = vmatmul.mubr.f32.vlgmr.msra.gmra.mrb[0].mxu1 %v564_v23  ;;  %v566_v29 = vmax.f32 %v476_v24, 0.0 }
 0x184   : > { %v567_v27 = vmax.f32 %v478_v26, 0.0  ;;  %v481_v28 = vpop.f32.mrb[4].mxu0  ;;  %1473 = vmatpush3.bf16.msra.mxu1 %v2058_v41 }
 0x185   : > { %v482_v30 = vadd.f32 %v481_v28, %v2104_v15  ;;  %v483_v31 = vpop.f32.mrb[5].mxu0  ;;  %1466 = vmatprep.subr.bf16.mxu1 %v2060_v42 }
 0x186   : > { %v484_v32 = vadd.f32 %v483_v31, %v2108_v16  ;;  %742 = vmatprep.mubr.f32.mxu1 %v567_v27 }
 0x187   : > { %743 = vmatmul.mubr.f32.gmra.mrb[2].mxu1 %v566_v29  ;;  %v568_v35 = vmax.f32 %v482_v30, 0.0 }
 0x188   : > { %v569_v33 = vmax.f32 %v484_v32, 0.0  ;;  %v487_v34 = vpop.f32.mrb[6].mxu0  ;;  %1474 = vmatpush3.bf16.msra.mxu1 %v2063_v47 }
 0x189   : > { %v488_v36 = vadd.f32 %v487_v34, %v2104_v15  ;;  %v489_v37 = vpop.f32.mrb[7].mxu0  ;;  %1467 = vmatprep.subr.bf16.mxu1 %v2066_v48 }
 0x18a   : > { %v490_v38 = vadd.f32 %v489_v37, %v2108_v16  ;;  %748 = vmatprep.mubr.f32.mxu1 %v569_v33 }
 0x18b   : > { %749 = vmatmul.mubr.f32.gmra.mrb[4].mxu1 %v568_v35  ;;  %v570_v40 = vmax.f32 %v488_v36, 0.0 }
 0x18c   : > { %v571_v39 = vmax.f32 %v490_v38, 0.0  ;;  %v493_v0 = vpop.f32.mrb[8].mxu0  ;;  %1475 = vmatpush3.bf16.msra.mxu1 %v2069_v53 }
 0x18d   : > { %v494_v41 = vadd.f32 %v493_v0, %v2104_v15  ;;  %v495_v42 = vpop.f32.mrb[9].mxu0  ;;  %1468 = vmatprep.subr.bf16.mxu1 %v2072_v54 }
 0x18e   : > { %v496_v43 = vadd.f32 %v495_v42, %v2108_v16  ;;  %754 = vmatprep.mubr.f32.mxu1 %v571_v39 }
 0x18f   : > { %755 = vmatmul.mubr.f32.gmra.mrb[6].mxu1 %v570_v40  ;;  %v572_v46 = vmax.f32 %v494_v41, 0.0 }
 0x190   : > { %v573_v44 = vmax.f32 %v496_v43, 0.0  ;;  %v499_v45 = vpop.f32.mrb[10].mxu0  ;;  %1476 = vmatpush3.bf16.msra.mxu1 %v2075_v59 }
 0x191   : > { %v500_v47 = vadd.f32 %v499_v45, %v2104_v15  ;;  %v501_v48 = vpop.f32.mrb[11].mxu0  ;;  %1469 = vmatprep.subr.bf16.mxu1 %v2078_v60 }
 0x192   : > { %v502_v49 = vadd.f32 %v501_v48, %v2108_v16  ;;  %760 = vmatprep.mubr.f32.mxu1 %v573_v44 }
 0x193   : > { %761 = vmatmul.mubr.f32.gmra.mrb[8].mxu1 %v572_v46  ;;  %v574_v52 = vmax.f32 %v500_v47, 0.0 }
 0x194   : > { %v575_v50 = vmax.f32 %v502_v49, 0.0  ;;  %v505_v51 = vpop.f32.mrb[12].mxu0  ;;  %1477 = vmatpush3.bf16.msra.mxu1 %v2081_v2 }
 0x195   : > { %v506_v53 = vadd.f32 %v505_v51, %v2104_v15  ;;  %v507_v54 = vpop.f32.mrb[13].mxu0  ;;  %1470 = vmatprep.subr.bf16.mxu1 %v2084_v3 }
 0x196   : > { %v508_v55 = vadd.f32 %v507_v54, %v2108_v16  ;;  %766 = vmatprep.mubr.f32.mxu1 %v575_v50  ;;  %v877_v54 = vld [vmem:[#allocation8 + $0x60] sm:$0xff] }
 0x197   : > { %767 = vmatmul.mubr.f32.gmra.mrb[10].mxu1 %v574_v52  ;;  %v576_v58 = vmax.f32 %v506_v53, 0.0 }
 0x198   : > { %v577_v56 = vmax.f32 %v508_v55, 0.0  ;;  %v511_v57 = vpop.f32.mrb[14].mxu0  ;;  %1478 = vmatpush3.bf16.msra.mxu1 %v2087_v8  ;;  %v878_v55 = vld [vmem:[#allocation8 + $0x68] sm:$0xff] }
 0x199   : > { %v512_v59 = vadd.f32 %v511_v57, %v2104_v15  ;;  %v513_v60 = vpop.f32.mrb[15].mxu0  ;;  %1471 = vmatprep.subr.bf16.mxu1 %v2090_v9  ;;  %v895_v57 = vld [vmem:[#allocation8 + $0xf0] sm:$0xff] }
 0x19a   : > { %v514_v61 = vadd.f32 %v513_v60, %v2108_v16  ;;  %772 = vmatprep.mubr.f32.mxu1 %v577_v56  ;;  %v1459_v56 = vpack.c.bf16 %v878_v55, %v877_v54  ;;  %v879_v60 = vld [vmem:[#allocation8 + $0x70] sm:$0xff] }
 0x19b   : > { %773 = vmatmul.mubr.f32.gmra.mrb[12].mxu1 %v576_v58  ;;  %v578_v1 = vmax.f32 %v512_v59, 0.0  ;;  %v896_v58 = vld [vmem:[#allocation8 + $0xf8] sm:$0xff] }
 0x19c   : > { %v579_v62 = vmax.f32 %v514_v61, 0.0  ;;  %v517_v63 = vpop.f32.mrb[16].mxu0  ;;  %1460 = vmatpush3.bf16.msra.mxu0 %v1459_v56  ;;  %1479 = vmatpush3.bf16.msra.mxu1 %v1459_v56  ;;  %v1461_v59 = vpack.c.bf16 %v896_v58, %v895_v57  ;;  %v880_v61 = vld [vmem:[#allocation8 + $0x78] sm:$0xff] }
 0x19d   : > { %v518_v2 = vadd.f32 %v517_v63, %v2104_v15  ;;  %v519_v3 = vpop.f32.mrb[17].mxu0 }
 0x19e   : > { %v520_v4 = vadd.f32 %v519_v3, %v2108_v16  ;;  %778 = vmatprep.mubr.f32.mxu1 %v579_v62  ;;  %1462 = vmatprep.subr.bf16.mxu0 %v1461_v59 }
 0x19f   : > { %779 = vmatmul.mubr.f32.gmra.mrb[14].mxu1 %v578_v1  ;;  %v580_v7 = vmax.f32 %v518_v2, 0.0  ;;  %1472 = vmatprep.subr.bf16.mxu1 %v1461_v59 }
 0x1a0   : > { %v581_v5 = vmax.f32 %v520_v4, 0.0  ;;  %v523_v6 = vpop.f32.mrb[18].mxu0 }
 0x1a1   : > { %v524_v8 = vadd.f32 %v523_v6, %v2104_v15  ;;  %v525_v9 = vpop.f32.mrb[19].mxu0 }
 0x1a2   : > { %v526_v13 = vadd.f32 %v525_v9, %v2108_v16  ;;  %784 = vmatprep.mubr.f32.mxu1 %v581_v5 }
 0x1a3   : > { %785 = vmatmul.mubr.f32.gmra.mrb[16].mxu1 %v580_v7  ;;  %v582_v19 = vmax.f32 %v524_v8, 0.0 }
 0x1a4   : > { %v583_v17 = vmax.f32 %v526_v13, 0.0  ;;  %v529_v18 = vpop.f32.mrb[20].mxu0 }
 0x1a5   : > { %v530_v20 = vadd.f32 %v529_v18, %v2104_v15  ;;  %v531_v21 = vpop.f32.mrb[21].mxu0 }
 0x1a6   : > { %v532_v22 = vadd.f32 %v531_v21, %v2108_v16  ;;  %790 = vmatprep.mubr.f32.mxu1 %v583_v17 }
 0x1a7   : > { %791 = vmatmul.mubr.f32.gmra.mrb[18].mxu1 %v582_v19  ;;  %v584_v25 = vmax.f32 %v530_v20, 0.0 }
 0x1a8   : > { %v585_v23 = vmax.f32 %v532_v22, 0.0  ;;  %v535_v24 = vpop.f32.mrb[22].mxu0 }
 0x1a9   : > { %v536_v26 = vadd.f32 %v535_v24, %v2104_v15  ;;  %v537_v27 = vpop.f32.mrb[23].mxu0 }
 0x1aa   : > { %v538_v28 = vadd.f32 %v537_v27, %v2108_v16  ;;  %796 = vmatprep.mubr.f32.mxu1 %v585_v23 }
 0x1ab   : > { %797 = vmatmul.mubr.f32.gmra.mrb[20].mxu1 %v584_v25  ;;  %v586_v31 = vmax.f32 %v536_v26, 0.0 }
 0x1ac   : > { %v587_v29 = vmax.f32 %v538_v28, 0.0  ;;  %v541_v30 = vpop.f32.mrb[24].mxu0 }
 0x1ad   : > { %v542_v32 = vadd.f32 %v541_v30, %v2104_v15  ;;  %v543_v33 = vpop.f32.mrb[25].mxu0 }
 0x1ae   : > { %v544_v34 = vadd.f32 %v543_v33, %v2108_v16  ;;  %802 = vmatprep.mubr.f32.mxu1 %v587_v29 }
 0x1af   : > { %803 = vmatmul.mubr.f32.gmra.mrb[22].mxu1 %v586_v31  ;;  %v588_v37 = vmax.f32 %v542_v32, 0.0 }
 0x1b0   : > { %v589_v35 = vmax.f32 %v544_v34, 0.0  ;;  %v547_v36 = vpop.f32.mrb[26].mxu0 }
 0x1b1   : > { %v548_v38 = vadd.f32 %v547_v36, %v2104_v15  ;;  %v549_v39 = vpop.f32.mrb[27].mxu0 }
 0x1b2   : > { %v550_v0 = vadd.f32 %v549_v39, %v2108_v16  ;;  %808 = vmatprep.mubr.f32.mxu1 %v589_v35 }
 0x1b3   : > { %809 = vmatmul.mubr.f32.gmra.mrb[24].mxu1 %v588_v37  ;;  %v590_v42 = vmax.f32 %v548_v38, 0.0 }
 0x1b4   : > { %v591_v40 = vmax.f32 %v550_v0, 0.0  ;;  %v553_v41 = vpop.f32.mrb[28].mxu0 }
 0x1b5   : > { %v554_v43 = vadd.f32 %v553_v41, %v2104_v15  ;;  %v555_v44 = vpop.f32.mrb[29].mxu0 }
 0x1b6   : > { %v556_v45 = vadd.f32 %v555_v44, %v2108_v16  ;;  %814 = vmatprep.mubr.f32.mxu1 %v591_v40 }
 0x1b7   : > { %815 = vmatmul.mubr.f32.gmra.mrb[26].mxu1 %v590_v42  ;;  %v592_v48 = vmax.f32 %v554_v43, 0.0 }
 0x1b8   : > { %v593_v46 = vmax.f32 %v556_v45, 0.0  ;;  %v559_v47 = vpop.f32.mrb[30].mxu0 }
 0x1b9   : > { %v560_v49 = vadd.f32 %v559_v47, %v2104_v15  ;;  %v561_v50 = vpop.f32.mrb[31].mxu0  ;;  %v1463_v15 = vpack.c.bf16 %v880_v61, %v879_v60 }
 0x1ba   : > { %v562_v51 = vadd.f32 %v561_v50, %v2108_v16  ;;  %820 = vmatprep.mubr.f32.mxu1 %v593_v46  ;;  %v660_v16 = vld [vmem:[%s2330_s4] sm:$0x3] }
 0x1bb   : > { %821 = vmatmul.mubr.f32.gmra.mrb[28].mxu1 %v592_v48  ;;  %v594_v53 = vmax.f32 %v560_v49, 0.0  ;;  %1464 = vmatpush3.bf16.msra.mxu0 %v1463_v15  ;;  %v2159_v62 = vrot.slane %v660_v16, %v395_v12  ;;  %v2163_v63 = vrot.slane %v660_v16, %v399_v14 }
 0x1bc   : > { %v595_v52 = vmax.f32 %v562_v51, 0.0  ;;  %1480 = vmatpush3.bf16.msra.mxu1 %v1463_v15 }
 0x1be   : > { %826 = vmatprep.mubr.f32.mxu1 %v595_v52 }
 0x1bf   : > { %827 = vmatmul.mubr.f32.gmra.mrb[30].mxu1 %v594_v53 }
 0x256   : > { %v738_v1 = vpop.f32.mrb[0].mxu1 }
 0x257   : > { %v739_v2 = vadd.f32 %v738_v1, %v2159_v62  ;;  %v740_v3 = vpop.f32.mrb[1].mxu1 }
 0x258   : > { %v741_v4 = vadd.f32 %v740_v3, %v2163_v63 }
 0x259   : > { %v833_v7 = vmax.f32 %v739_v2, 0.0 }
 0x25a   : > { %v834_v5 = vmax.f32 %v741_v4, 0.0  ;;  %v744_v6 = vpop.f32.mrb[2].mxu1 }
 0x25b   : > { %v745_v8 = vadd.f32 %v744_v6, %v2159_v62  ;;  %v746_v9 = vpop.f32.mrb[3].mxu1 }
 0x25c   : > { %v747_v13 = vadd.f32 %v746_v9, %v2163_v63  ;;  %968 = vmatprep.mubr.f32.mxu0 %v834_v5 }
 0x25d   : > { %969 = vmatmul.mubr.f32.vlgmr.msra.gmra.mrb[32].mxu0 %v833_v7  ;;  %v835_v14 = vmax.f32 %v745_v8, 0.0 }
 0x25e   : > { %v836_v12 = vmax.f32 %v747_v13, 0.0  ;;  %v750_v11 = vpop.f32.mrb[4].mxu1 }
 0x25f   : > { %v751_v17 = vadd.f32 %v750_v11, %v2159_v62  ;;  %v752_v18 = vpop.f32.mrb[5].mxu1 }
 0x260   : > { %v753_v19 = vadd.f32 %v752_v18, %v2163_v63  ;;  %973 = vmatprep.mubr.f32.mxu0 %v836_v12 }
 0x261   : > { %974 = vmatmul.mubr.f32.gmra.mrb[34].mxu0 %v835_v14  ;;  %v837_v22 = vmax.f32 %v751_v17, 0.0 }
 0x262   : > { %v838_v20 = vmax.f32 %v753_v19, 0.0  ;;  %v756_v21 = vpop.f32.mrb[6].mxu1 }
 0x263   : > { %v757_v23 = vadd.f32 %v756_v21, %v2159_v62  ;;  %v758_v24 = vpop.f32.mrb[7].mxu1 }
 0x264   : > { %v759_v25 = vadd.f32 %v758_v24, %v2163_v63  ;;  %978 = vmatprep.mubr.f32.mxu0 %v838_v20 }
 0x265   : > { %979 = vmatmul.mubr.f32.gmra.mrb[36].mxu0 %v837_v22  ;;  %v839_v28 = vmax.f32 %v757_v23, 0.0 }
 0x266   : > { %v840_v26 = vmax.f32 %v759_v25, 0.0  ;;  %v762_v27 = vpop.f32.mrb[8].mxu1 }
 0x267   : > { %v763_v29 = vadd.f32 %v762_v27, %v2159_v62  ;;  %v764_v30 = vpop.f32.mrb[9].mxu1 }
 0x268   : > { %v765_v31 = vadd.f32 %v764_v30, %v2163_v63  ;;  %983 = vmatprep.mubr.f32.mxu0 %v840_v26 }
 0x269   : > { %984 = vmatmul.mubr.f32.gmra.mrb[38].mxu0 %v839_v28  ;;  %v841_v34 = vmax.f32 %v763_v29, 0.0 }
 0x26a   : > { %v842_v32 = vmax.f32 %v765_v31, 0.0  ;;  %v768_v33 = vpop.f32.mrb[10].mxu1 }
 0x26b   : > { %v769_v35 = vadd.f32 %v768_v33, %v2159_v62  ;;  %v770_v36 = vpop.f32.mrb[11].mxu1 }
 0x26c   : > { %v771_v37 = vadd.f32 %v770_v36, %v2163_v63  ;;  %988 = vmatprep.mubr.f32.mxu0 %v842_v32 }
 0x26d   : > { %989 = vmatmul.mubr.f32.gmra.mrb[40].mxu0 %v841_v34  ;;  %v843_v0 = vmax.f32 %v769_v35, 0.0 }
 0x26e   : > { %v844_v38 = vmax.f32 %v771_v37, 0.0  ;;  %v774_v39 = vpop.f32.mrb[12].mxu1 }
 0x26f   : > { %v775_v40 = vadd.f32 %v774_v39, %v2159_v62  ;;  %v776_v41 = vpop.f32.mrb[13].mxu1 }
 0x270   : > { %v777_v42 = vadd.f32 %v776_v41, %v2163_v63  ;;  %993 = vmatprep.mubr.f32.mxu0 %v844_v38 }
 0x271   : > { %994 = vmatmul.mubr.f32.gmra.mrb[42].mxu0 %v843_v0  ;;  %v845_v45 = vmax.f32 %v775_v40, 0.0  ;;  %v1050_v0 = vand.u32 127, %v393_v10  ;;  %v2201_v40 = vld [vmem:[%s2332_s6] ss:$0 sm:$0xff] }
 0x272   : > { %v846_v43 = vmax.f32 %v777_v42, 0.0  ;;  %v780_v44 = vpop.f32.mrb[14].mxu1 }
 0x273   : > { %v781_v46 = vadd.f32 %v780_v44, %v2159_v62  ;;  %v782_v47 = vpop.f32.mrb[15].mxu1  ;;  %vm1051_vm0 = vcmp.ge.s32.totalorder %v1050_v0, 4  ;;  %vm1052_vm1 = vcmp.lt.s32.totalorder %v1050_v0, 8 }
 0x274   : > { %v783_v48 = vadd.f32 %v782_v47, %v2163_v63  ;;  %998 = vmatprep.mubr.f32.mxu0 %v846_v43  ;;  %vm2204_vm2 = vmand %vm1051_vm0, %vm1052_vm1 }
 0x275   : > { %999 = vmatmul.mubr.f32.gmra.mrb[44].mxu0 %v845_v45  ;;  %v847_v51 = vmax.f32 %v781_v46, 0.0 }
 0x276   : > { %v848_v49 = vmax.f32 %v783_v48, 0.0  ;;  %v786_v50 = vpop.f32.mrb[16].mxu1 }
 0x277   : > { %v787_v52 = vadd.f32 %v786_v50, %v2159_v62  ;;  %v788_v53 = vpop.f32.mrb[17].mxu1 }
 0x278   : > { %v789_v54 = vadd.f32 %v788_v53, %v2163_v63  ;;  %1003 = vmatprep.mubr.f32.mxu0 %v848_v49 }
 0x279   : > { %1004 = vmatmul.mubr.f32.gmra.mrb[46].mxu0 %v847_v51  ;;  %v849_v57 = vmax.f32 %v787_v52, 0.0 }
 0x27a   : > { %v850_v55 = vmax.f32 %v789_v54, 0.0  ;;  %v792_v56 = vpop.f32.mrb[18].mxu1 }
 0x27b   : > { %v793_v58 = vadd.f32 %v792_v56, %v2159_v62  ;;  %v794_v59 = vpop.f32.mrb[19].mxu1 }
 0x27c   : > { %v795_v60 = vadd.f32 %v794_v59, %v2163_v63  ;;  %1008 = vmatprep.mubr.f32.mxu0 %v850_v55 }
 0x27d   : > { %1009 = vmatmul.mubr.f32.gmra.mrb[48].mxu0 %v849_v57  ;;  %v851_v16 = vmax.f32 %v793_v58, 0.0 }
 0x27e   : > { %v852_v61 = vmax.f32 %v795_v60, 0.0  ;;  %v798_v15 = vpop.f32.mrb[20].mxu1 }
 0x27f   : > { %v799_v1 = vadd.f32 %v798_v15, %v2159_v62  ;;  %v800_v2 = vpop.f32.mrb[21].mxu1 }
 0x280   : > { %v801_v3 = vadd.f32 %v800_v2, %v2163_v63  ;;  %1013 = vmatprep.mubr.f32.mxu0 %v852_v61 }
 0x281   : > { %1014 = vmatmul.mubr.f32.gmra.mrb[50].mxu0 %v851_v16  ;;  %v853_v6 = vmax.f32 %v799_v1, 0.0 }
 0x282   : > { %v854_v4 = vmax.f32 %v801_v3, 0.0  ;;  %v804_v5 = vpop.f32.mrb[22].mxu1 }
 0x283   : > { %v805_v7 = vadd.f32 %v804_v5, %v2159_v62  ;;  %v806_v8 = vpop.f32.mrb[23].mxu1 }
 0x284   : > { %v807_v9 = vadd.f32 %v806_v8, %v2163_v63  ;;  %1018 = vmatprep.mubr.f32.mxu0 %v854_v4 }
 0x285   : > { %1019 = vmatmul.mubr.f32.gmra.mrb[52].mxu0 %v853_v6  ;;  %v855_v11 = vmax.f32 %v805_v7, 0.0 }
 0x286   : > { %v856_v13 = vmax.f32 %v807_v9, 0.0  ;;  %v810_v12 = vpop.f32.mrb[24].mxu1 }
 0x287   : > { %v811_v14 = vadd.f32 %v810_v12, %v2159_v62  ;;  %v812_v17 = vpop.f32.mrb[25].mxu1 }
 0x288   : > { %v813_v18 = vadd.f32 %v812_v17, %v2163_v63  ;;  %1023 = vmatprep.mubr.f32.mxu0 %v856_v13 }
 0x289   : > { %1024 = vmatmul.mubr.f32.gmra.mrb[54].mxu0 %v855_v11  ;;  %v857_v21 = vmax.f32 %v811_v14, 0.0 }
 0x28a   : > { %v858_v19 = vmax.f32 %v813_v18, 0.0  ;;  %v816_v20 = vpop.f32.mrb[26].mxu1 }
 0x28b   : > { %v817_v22 = vadd.f32 %v816_v20, %v2159_v62  ;;  %v818_v23 = vpop.f32.mrb[27].mxu1 }
 0x28c   : > { %v819_v24 = vadd.f32 %v818_v23, %v2163_v63  ;;  %1028 = vmatprep.mubr.f32.mxu1 %v858_v19 }
 0x28d   : > { %1029 = vmatmul.mubr.f32.vlgmr.msra.gmra.mrb[32].mxu1 %v857_v21  ;;  %v859_v27 = vmax.f32 %v817_v22, 0.0 }
 0x28e   : > { %v860_v25 = vmax.f32 %v819_v24, 0.0  ;;  %v822_v26 = vpop.f32.mrb[28].mxu1 }
 0x28f   : > { %v823_v28 = vadd.f32 %v822_v26, %v2159_v62  ;;  %v824_v29 = vpop.f32.mrb[29].mxu1 }
 0x290   : > { %v825_v30 = vadd.f32 %v824_v29, %v2163_v63  ;;  %1033 = vmatprep.mubr.f32.mxu1 %v860_v25 }
 0x291   : > { %1034 = vmatmul.mubr.f32.gmra.mrb[34].mxu1 %v859_v27  ;;  %v861_v33 = vmax.f32 %v823_v28, 0.0 }
 0x292   : > { %v862_v31 = vmax.f32 %v825_v30, 0.0  ;;  %v828_v32 = vpop.f32.mrb[30].mxu1 }
 0x293   : > { %v829_v34 = vadd.f32 %v828_v32, %v2159_v62  ;;  %v830_v35 = vpop.f32.mrb[31].mxu1 }
 0x294   : > { %v831_v36 = vadd.f32 %v830_v35, %v2163_v63  ;;  %1038 = vmatprep.mubr.f32.mxu1 %v862_v31 }
 0x295   : > { %1039 = vmatmul.mubr.f32.gmra.mrb[36].mxu1 %v861_v33  ;;  %v863_v38 = vmax.f32 %v829_v34, 0.0 }
 0x296   : > { %v864_v37 = vmax.f32 %v831_v36, 0.0 }
 0x298   : > { %1043 = vmatprep.mubr.f32.mxu1 %v864_v37 }
 0x299   : > { %1044 = vmatmul.mubr.f32.gmra.mrb[38].mxu1 %v863_v38 }
 0x330   : > { %v1289_v39 = vpop.f32.mrb[32].mxu0 }
 0x331   : > { %v1290_v41 = vpop.f32.mrb[33].mxu0 }
 0x332   : > { %v1291_v42 = vadd.f32 %v1290_v41, %v1289_v39 }
 0x334   : > { %v971_v62 = vadd.f32 %v1291_v42, %v2201_v40  ;;  %v1292_v63 = vpop.f32.mrb[34].mxu0 }
 0x335   : > { %v1293_v43 = vpop.f32.mrb[35].mxu0 }
 0x336   : > { %v1054_v44 = vmax.f32 %v971_v62, 1e-06  ;;  %v1294_v45 = vadd.f32 %v1293_v43, %v1292_v63 }
 0x338   : > { %v1070_v10 = vmin.f32 %v1054_v44, 1.0  ;;  %v976_v47 = vadd.f32 %v1294_v45, %v2201_v40  ;;  %v1295_v48 = vpop.f32.mrb[36].mxu0 }
 0x339   : > { %v1296_v49 = vpop.f32.mrb[37].mxu0 }
 0x33a   : > { %v1086_v50 = vsel %vm2204_vm2, %v1070_v10, %v971_v62  ;;  %v1055_v51 = vmax.f32 %v976_v47, 1e-06  ;;  %v1297_v52 = vadd.f32 %v1296_v49, %v1295_v48 }
 0x33b   : > { %1102 = vst [vmem:[%s2213_s17] sm:$0xff] %v1086_v50 }
 0x33c   : > { %v1071_v53 = vmin.f32 %v1055_v51, 1.0  ;;  %v981_v54 = vadd.f32 %v1297_v52, %v2201_v40  ;;  %v1298_v55 = vpop.f32.mrb[38].mxu0 }
 0x33d   : > { %v1299_v56 = vpop.f32.mrb[39].mxu0 }
 0x33e   : > { %v1087_v57 = vsel %vm2204_vm2, %v1071_v53, %v976_v47  ;;  %v1056_v58 = vmax.f32 %v981_v54, 1e-06  ;;  %v1300_v59 = vadd.f32 %v1299_v56, %v1298_v55 }
 0x33f   : > { %1103 = vst [vmem:[%s2213_s17 + $0x8] sm:$0xff] %v1087_v57 }
 0x340   : > { %v1072_v60 = vmin.f32 %v1056_v58, 1.0  ;;  %v986_v61 = vadd.f32 %v1300_v59, %v2201_v40  ;;  %v1301_v15 = vpop.f32.mrb[40].mxu0 }
 0x341   : > { %v1302_v16 = vpop.f32.mrb[41].mxu0 }
 0x342   : > { %v1088_v1 = vsel %vm2204_vm2, %v1072_v60, %v981_v54  ;;  %v1057_v2 = vmax.f32 %v986_v61, 1e-06  ;;  %v1303_v3 = vadd.f32 %v1302_v16, %v1301_v15 }
 0x343   : > { %1104 = vst [vmem:[%s2213_s17 + $0x10] sm:$0xff] %v1088_v1 }
 0x344   : > { %v1073_v4 = vmin.f32 %v1057_v2, 1.0  ;;  %v991_v5 = vadd.f32 %v1303_v3, %v2201_v40  ;;  %v1304_v6 = vpop.f32.mrb[42].mxu0 }
 0x345   : > { %v1305_v7 = vpop.f32.mrb[43].mxu0 }
 0x346   : > { %v1089_v8 = vsel %vm2204_vm2, %v1073_v4, %v986_v61  ;;  %v1058_v9 = vmax.f32 %v991_v5, 1e-06  ;;  %v1306_v13 = vadd.f32 %v1305_v7, %v1304_v6 }
 0x347   : > { %1105 = vst [vmem:[%s2213_s17 + $0x18] sm:$0xff] %v1089_v8 }
 0x348   : > { %v1074_v12 = vmin.f32 %v1058_v9, 1.0  ;;  %v996_v11 = vadd.f32 %v1306_v13, %v2201_v40  ;;  %v1307_v14 = vpop.f32.mrb[44].mxu0 }
 0x349   : > { %v1308_v17 = vpop.f32.mrb[45].mxu0 }
 0x34a   : > { %v1090_v18 = vsel %vm2204_vm2, %v1074_v12, %v991_v5  ;;  %v1059_v19 = vmax.f32 %v996_v11, 1e-06  ;;  %v1309_v20 = vadd.f32 %v1308_v17, %v1307_v14 }
 0x34b   : > { %1106 = vst [vmem:[%s2213_s17 + $0x20] sm:$0xff] %v1090_v18 }
 0x34c   : > { %v1075_v21 = vmin.f32 %v1059_v19, 1.0  ;;  %v1001_v22 = vadd.f32 %v1309_v20, %v2201_v40  ;;  %v1310_v23 = vpop.f32.mrb[46].mxu0 }
 0x34d   : > { %v1311_v24 = vpop.f32.mrb[47].mxu0 }
 0x34e   : > { %v1091_v25 = vsel %vm2204_vm2, %v1075_v21, %v996_v11  ;;  %v1060_v26 = vmax.f32 %v1001_v22, 1e-06  ;;  %v1312_v27 = vadd.f32 %v1311_v24, %v1310_v23 }
 0x34f   : > { %1107 = vst [vmem:[%s2213_s17 + $0x28] sm:$0xff] %v1091_v25 }
 0x350   : > { %v1076_v28 = vmin.f32 %v1060_v26, 1.0  ;;  %v1006_v29 = vadd.f32 %v1312_v27, %v2201_v40  ;;  %v1313_v30 = vpop.f32.mrb[48].mxu0 }
 0x351   : > { %v1314_v31 = vpop.f32.mrb[49].mxu0 }
 0x352   : > { %v1092_v32 = vsel %vm2204_vm2, %v1076_v28, %v1001_v22  ;;  %v1061_v33 = vmax.f32 %v1006_v29, 1e-06  ;;  %v1315_v34 = vadd.f32 %v1314_v31, %v1313_v30 }
 0x353   : > { %1108 = vst [vmem:[%s2213_s17 + $0x30] sm:$0xff] %v1092_v32 }
 0x354   : > { %v1077_v35 = vmin.f32 %v1061_v33, 1.0  ;;  %v1011_v36 = vadd.f32 %v1315_v34, %v2201_v40  ;;  %v1316_v37 = vpop.f32.mrb[50].mxu0 }
 0x355   : > { %v1317_v38 = vpop.f32.mrb[51].mxu0 }
 0x356   : > { %v1093_v39 = vsel %vm2204_vm2, %v1077_v35, %v1006_v29  ;;  %v1062_v0 = vmax.f32 %v1011_v36, 1e-06  ;;  %v1318_v41 = vadd.f32 %v1317_v38, %v1316_v37 }
 0x357   : > { %1109 = vst [vmem:[%s2213_s17 + $0x38] sm:$0xff] %v1093_v39 }
 0x358   : > { %v1078_v42 = vmin.f32 %v1062_v0, 1.0  ;;  %v1016_v62 = vadd.f32 %v1318_v41, %v2201_v40  ;;  %v1319_v63 = vpop.f32.mrb[52].mxu0 }
 0x359   : > { %v1320_v43 = vpop.f32.mrb[53].mxu0 }
 0x35a   : > { %v1094_v44 = vsel %vm2204_vm2, %v1078_v42, %v1011_v36  ;;  %v1063_v45 = vmax.f32 %v1016_v62, 1e-06  ;;  %v1321_v10 = vadd.f32 %v1320_v43, %v1319_v63 }
 0x35b   : > { %1110 = vst [vmem:[%s2213_s17 + $0x40] sm:$0xff] %v1094_v44 }
 0x35c   : > { %v1079_v47 = vmin.f32 %v1063_v45, 1.0  ;;  %v1021_v48 = vadd.f32 %v1321_v10, %v2201_v40  ;;  %v1322_v49 = vpop.f32.mrb[54].mxu0 }
 0x35d   : > { %v1323_v50 = vpop.f32.mrb[55].mxu0 }
 0x35e   : > { %v1095_v51 = vsel %vm2204_vm2, %v1079_v47, %v1016_v62  ;;  %v1064_v52 = vmax.f32 %v1021_v48, 1e-06  ;;  %v1324_v53 = vadd.f32 %v1323_v50, %v1322_v49 }
 0x35f   : > { %1111 = vst [vmem:[%s2213_s17 + $0x48] sm:$0xff] %v1095_v51 }
 0x360   : > { %v1080_v54 = vmin.f32 %v1064_v52, 1.0  ;;  %v1026_v55 = vadd.f32 %v1324_v53, %v2201_v40  ;;  %v1325_v56 = vpop.f32.mrb[32].mxu1 }
 0x361   : > { %v1326_v57 = vpop.f32.mrb[33].mxu1 }
 0x362   : > { %v1096_v58 = vsel %vm2204_vm2, %v1080_v54, %v1021_v48  ;;  %v1065_v59 = vmax.f32 %v1026_v55, 1e-06  ;;  %v1327_v60 = vadd.f32 %v1326_v57, %v1325_v56 }
 0x363   : > { %1112 = vst [vmem:[%s2213_s17 + $0x50] sm:$0xff] %v1096_v58 }
 0x364   : > { %v1081_v61 = vmin.f32 %v1065_v59, 1.0  ;;  %v1031_v15 = vadd.f32 %v1327_v60, %v2201_v40  ;;  %v1328_v16 = vpop.f32.mrb[34].mxu1 }
 0x365   : > { %v1329_v1 = vpop.f32.mrb[35].mxu1 }
 0x366   : > { %v1097_v2 = vsel %vm2204_vm2, %v1081_v61, %v1026_v55  ;;  %v1066_v3 = vmax.f32 %v1031_v15, 1e-06  ;;  %v1330_v4 = vadd.f32 %v1329_v1, %v1328_v16 }
 0x367   : > { %1113 = vst [vmem:[%s2213_s17 + $0x58] sm:$0xff] %v1097_v2 }
 0x368   : > { %v1082_v5 = vmin.f32 %v1066_v3, 1.0  ;;  %v1036_v6 = vadd.f32 %v1330_v4, %v2201_v40  ;;  %v1331_v7 = vpop.f32.mrb[36].mxu1 }
 0x369   : > { %v1332_v8 = vpop.f32.mrb[37].mxu1 }
 0x36a   : > { %v1098_v9 = vsel %vm2204_vm2, %v1082_v5, %v1031_v15  ;;  %v1067_v13 = vmax.f32 %v1036_v6, 1e-06  ;;  %v1333_v12 = vadd.f32 %v1332_v8, %v1331_v7 }
 0x36b   : > { %1114 = vst [vmem:[%s2213_s17 + $0x60] sm:$0xff] %v1098_v9 }
 0x36c   : > { %v1083_v11 = vmin.f32 %v1067_v13, 1.0  ;;  %v1041_v14 = vadd.f32 %v1333_v12, %v2201_v40  ;;  %v1334_v17 = vpop.f32.mrb[38].mxu1 }
 0x36d   : > { %v1335_v18 = vpop.f32.mrb[39].mxu1 }
 0x36e   : > { %v1099_v19 = vsel %vm2204_vm2, %v1083_v11, %v1036_v6  ;;  %v1068_v20 = vmax.f32 %v1041_v14, 1e-06  ;;  %v1336_v21 = vadd.f32 %v1335_v18, %v1334_v17 }
 0x36f   : > { %1115 = vst [vmem:[%s2213_s17 + $0x68] sm:$0xff] %v1099_v19 }
 0x370   : > { %v1084_v22 = vmin.f32 %v1068_v20, 1.0  ;;  %v1046_v23 = vadd.f32 %v1336_v21, %v2201_v40 }
 0x372   : > { %v1100_v24 = vsel %vm2204_vm2, %v1084_v22, %v1041_v14  ;;  %v1069_v25 = vmax.f32 %v1046_v23, 1e-06 }
 0x373   : > { %1116 = vst [vmem:[%s2213_s17 + $0x70] sm:$0xff] %v1100_v24 }
 0x374   : > { %v1085_v26 = vmin.f32 %v1069_v25, 1.0 }
 0x376   : > { %v1101_v40 = vsel %vm2204_vm2, %v1085_v26, %v1046_v23 }
 0x377   : > { %1117 = vst [vmem:[%s2213_s17 + $0x78] sm:$0xff] %v1101_v40 }
 0x378   : > { %1692 = shalt.err (!%p1689_p4)
}
 0x379   : > { %s1693_s14 = scalar_lea.hbm %s2277_s23, 2048  ;;  %s1697_s13 = scalar_lea.hbm %s2333_s7, 4096 }
 0x37a   : > { %p1694_p9 = scmp.ne.s32.totalorder %s2277_s23, %s1693_s14  ;;  %p1698_p8 = scmp.lt.u32.totalorder %s2277_s23, %s2333_s7 }
 0x37b   : > { %p1699_p13 = scmp.lt.u32.totalorder %s1697_s13, %s1693_s14  ;;  %p1701_p10 = scmp.lt.u32.totalorder %s1693_s14, %s2277_s23 }
 0x37c   : > { %p1695_p0 = pnand %p1694_p9, %p1955_p5 }
 0x37d   : > { %p1700_p6 = por %p1699_p13, %p1698_p8 }
 0x37e   : > { %p1696_p11 = pneg %p1695_p0 }
 0x37f   : > { %p1702_p3 = por %p1701_p10, %p1700_p6 }
 0x381   : > { %p1703_p7 = pnand %p1702_p3, %p1696_p11 }
 0x383   : > { %1706 = shalt.err (!%p1703_p7)
}
 0x384   : > { %s1765_s16 = smov 128   ;;  %s1766_s29 = smov 8  }
 0x385   : > { %1495 = dma.vmem_to_hbm [thread:$0]  (%p1955_p5), %s2279_s21, 2048, %s2277_s23, %s1119_s28, %s1765_s16, %s1765_s16, %s1766_s29  }
 0x386 PF: > { %s2355_s11 = sld [smem:[#allocation15_spill]]  ;;  %s1147_s15 = sand.u32 1, %s1741_s24  }
 0x387   : > { %p2357_p2 = scmp.ge.s32.totalorder %s1753_s27, 2  ;;  %s1148_s30 = scalar_lea.sflag [#allocation4], %s1147_s15 }
 0x38c   : > { %p2356_p12 = scmp.ne.s32.totalorder %s2355_s11, 0 }
 0x38e   : > { %p1512_p1 = pnand %p2357_p2, %p2356_p12 }
 0x390   : > { %1736 = dma.done.wait (!%p1512_p1), %s1148_s30, 2048  }
 0x391   : > { %1738 = vsyncadd (!%p1512_p1), %s1148_s30, 4294965248  ;;  %p22_p4 = scmp.ge.s32.totalorder %s1941_s8, 4   ;;  %s2358_s24 = smov %s1745_s25 }
 0x392   : > { %s2359_s25 = smov %s1749_s26  ;;  %s2360_s26 = smov %s1951_s19 }
 0x393   : > { %s2361_s27 = smov %s1941_s8  ;;  %24 = sbr.rel (!%p22_p4) target bundleno = 7 (0x7), region = 105 }
 0x39a   :  { %1153 = vsyncpa [#allocation3], 1 }
 0x39b   :  { %1155 = vsyncpa [#allocation3 + $0x1], 1 }
 0x39c   :  { %1156 = vsyncpa [#allocation6], 1 }
 0x39d   :  { %1157 = vsyncpa [#allocation9], 1 }
 0x39e   :  { %1158 = vsyncpa [#allocation4], 1 }
 0x39f   :  { %1160 = vsyncpa [#allocation4 + $0x1], 1 }

</bundles_post_ra>
